<compile_context>
chip_gen: v6e
topology: v6e:2x2x1
jax: 0.10.0
libtpu: 0.0.40
codegen_flags: <defaults>
</compile_context>

<pallas_src>
import functools
import math

import jax
import jax.numpy as jnp
from jax.experimental import pallas as pl
from jax.experimental.pallas import tpu as pltpu

LRELU_SLOPE = 0.1


def _round_up(x, m):
    return ((x + m - 1) // m) * m


def _leaky_relu(v):
    return jnp.where(v >= 0, v, LRELU_SLOPE * v)


def _resident_spec(shape):
    """BlockSpec for a fully resident block (constant index_map).

    Single-buffered via pipeline_mode=pl.Buffered(1) when the running JAX supports it,
    so never-refetched weights don't pay the 2x double-buffer VMEM cost."""
    index_map = lambda *_: (0,) * len(shape)
    if hasattr(pl, "Buffered"):
        try:
            return pl.BlockSpec(shape, index_map, pipeline_mode=pl.Buffered(1))
        except TypeError:
            pass
    return pl.BlockSpec(shape, index_map)


def _resblock_kernel(len_ref, x_ref, lh_ref, rh_ref, *rest, K, dils, TT, Hw):
    """Fused ResBlock (all stages) on one (TT, C) output tile.

    rest = [w1_0, b1_0, w2_0, b2_0, w1_1, ...,  o_ref]
      w* : (K, C_in, C_out) tap-major weights (bf16), b*: (1, C) f32 biases.
    Per stage:  x = conv2( m * lrelu( conv1( m * lrelu(x) ) ) ) + x ; final: x * m.
    """
    S = len(dils)
    wrefs = rest[: 4 * S]
    o_ref = rest[4 * S]

    t = pl.program_id(0)
    n = pl.program_id(1)
    length = len_ref[n]
    Hw_tot = sum(Hw)
    t0 = t * TT

    # Haloed input band for the whole fused stack; kept in f32 across all stages so the
    # residual path is never re-rounded (only MXU operands are cast down).
    band = jnp.concatenate([lh_ref[...], x_ref[...], rh_ref[...]], axis=0)
    band = band.astype(jnp.float32)
    B0 = TT + 2 * Hw_tot

    # valid = inside [0, length): 'pos >= 0' reproduces conv zero padding at the left array
    # edge; 'pos < length' covers both the right edge (length <= T) and the prefix x_mask.
    pos = jax.lax.broadcasted_iota(jnp.int32, (B0, 1), 0) + (t0 - Hw_tot)
    valid = jnp.logical_and(pos >= 0, pos < length)          # (B0, 1) bool

    cum = 0           # start index of the current stage's band inside the full band
    G = Hw_tot        # halo rows remaining around the current band
    for s in range(S):
        d = dils[s]
        pad1 = d * (K - 1) // 2                 # conv1 "same" padding
        pad2 = (K - 1) // 2                     # conv2 "same" padding
        hw = Hw[s]                              # aligned halo consumed by this stage
        off1 = hw - (pad1 + pad2)               # alignment slack (>= 0)
        Bs = TT + 2 * G                         # stage input band length
        Bn = Bs - 2 * hw                        # stage output band length
        L1 = Bn + 2 * pad2                      # conv1 output band length (= conv2 input)

        w1 = wrefs[4 * s][...]
        b1 = wrefs[4 * s + 1][...]
        w2 = wrefs[4 * s + 2][...]
        b2 = wrefs[4 * s + 3][...]

        # conv1 (kernel K, dilation d): K accumulated (L1, C) @ (C, C) MXU matmuls.
        # (For C < 128 an im2col (L1, K*C) @ (K*C, C) form would pack the MXU better.)
        a1 = jnp.where(valid[cum:cum + Bs], _leaky_relu(band), 0.0).astype(w1.dtype)
        c1 = b1.astype(jnp.float32)
        for k in range(K):
            j = off1 + k * d
            c1 = c1 + jnp.dot(a1[j:j + L1, :], w1[k],
                              preferred_element_type=jnp.float32)

        # conv2 (kernel K, dilation 1).
        m2 = valid[cum + hw - pad2: cum + hw - pad2 + L1]
        a2 = jnp.where(m2, _leaky_relu(c1), 0.0).astype(w2.dtype)
        y = b2.astype(jnp.float32)
        for k in range(K):
            y = y + jnp.dot(a2[k:k + Bn, :], w2[k],
                            preferred_element_type=jnp.float32)

        band = y + band[hw:hw + Bn, :]          # residual add -> next stage's input band
        cum += hw
        G -= hw

    # Final apply_mask(x, x_mask); band is now exactly the (TT, C) output tile.
    out = jnp.where(valid[Hw_tot:Hw_tot + TT], band, 0.0)
    o_ref[...] = out.astype(o_ref.dtype)


def resblock_forward(x_ntc, lengths, params, *, time_tile=512):
    """Pallas ResBlockBase.forward.

    x_ntc   : (N, T, C) activations (dtype preserved; pass bf16 to halve HBM traffic).
    lengths : (N,) valid frames per row (prefix x_mask; all-T == x_mask=None).
    params  : list of per-stage dicts from init_params().
    """
    # TODO(synk): non-prefix x_mask tensors would need to be streamed as an extra input.
    N, T, C = x_ntc.shape
    K = params[0]["K"]
    dils = [p["d"] for p in params]
    S = len(params)

    # Per-stage receptive halos, rounded so every inter-stage band stays 8-row aligned.
    Hw = [_round_up(d * (K - 1) // 2 + (K - 1) // 2, 4) for d in dils]
    if sum(Hw) % 8:
        Hw[0] += 4
    Hw_tot = sum(Hw)

    tt = min(_round_up(time_tile, 8), _round_up(T, 8))
    tt = max(tt, _round_up(Hw_tot, 8))          # tile must cover the fused halo
    nT = -(-T // tt)
    Tr = nT * tt
    x = x_ntc if Tr == T else jnp.pad(x_ntc, ((0, 0), (0, Tr - T), (0, 0)))
    lengths = lengths.astype(jnp.int32)

    # Small aligned halo side-arrays built ONCE for the whole fused stack from cheap
    # slices of x (no padded full copy, no per-stage halo rebuild).
    xr = x.reshape(N, nT, tt, C)
    zero_halo = jnp.zeros((N, 1, Hw_tot, C), x.dtype)
    lh = jnp.concatenate([zero_halo, xr[:, :nT - 1, tt - Hw_tot:, :]], axis=1)
    rh = jnp.concatenate([xr[:, 1:, :Hw_tot, :], zero_halo], axis=1)

    weight_args, weight_specs = [], []
    for p in params:
        weight_args += [p["w1_kio"], p["b1_row"], p["w2_kio"], p["b2_row"]]
        weight_specs += [_resident_spec((K, C, C)), _resident_spec((1, C)),
                         _resident_spec((K, C, C)), _resident_spec((1, C))]

    kernel = functools.partial(_resblock_kernel, K=K, dils=tuple(dils), TT=tt,
                               Hw=tuple(Hw))

    grid_spec = pltpu.PrefetchScalarGridSpec(
        num_scalar_prefetch=1,                   # lengths -> SMEM
        grid=(nT, N),                            # time tiles first so megacore has work
        in_specs=[
            pl.BlockSpec((None, tt, C), lambda t, n, lens: (n, t, 0)),              # x tile
            pl.BlockSpec((None, None, Hw_tot, C), lambda t, n, lens: (n, t, 0, 0)),  # left halo
            pl.BlockSpec((None, None, Hw_tot, C), lambda t, n, lens: (n, t, 0, 0)),  # right halo
        ] + weight_specs,
        out_specs=pl.BlockSpec((None, tt, C), lambda t, n, lens: (n, t, 0)),
    )

    itemsize = x.dtype.itemsize
    w_bytes = sum(int(a.size) * a.dtype.itemsize for a in weight_args)
    cost = pl.CostEstimate(
        flops=4 * K * C * C * S * N * Tr,        # 2 convs x 2*K*C*C MACs per frame per stage
        transcendentals=0,
        bytes_accessed=(2 * N * Tr * C + 2 * N * nT * Hw_tot * C) * itemsize + w_bytes)

    out = pl.pallas_call(
        kernel,
        out_shape=jax.ShapeDtypeStruct((N, Tr, C), x.dtype),
        grid_spec=grid_spec,
        compiler_params=pltpu.CompilerParams(
            dimension_semantics=("parallel", "parallel"),
            vmem_limit_bytes=64 * 1024 * 1024),
        cost_estimate=cost,
    )(lengths, x, lh, rh, *weight_args)
    return out[:, :T, :]


def init_params(key, channels, kernel_size, dilations, matmul_dtype=jnp.bfloat16):
    # weight_norm is a pure reparametrization (its forward equals a plain conv with the
    # effective weight), so effective weights are initialized directly
    # (init_weights: normal(0, 0.01)); biases use the PyTorch Conv1d default uniform init.
    assert kernel_size % 2 == 1 and kernel_size >= 3
    bound = 1.0 / math.sqrt(channels * kernel_size)
    params = []
    for d in dilations:
        key, k1, k2, k3, k4 = jax.random.split(key, 5)
        w1 = jax.random.normal(k1, (channels, channels, kernel_size), jnp.float32) * 0.01
        w2 = jax.random.normal(k2, (channels, channels, kernel_size), jnp.float32) * 0.01
        b1 = jax.random.uniform(k3, (channels,), jnp.float32, -bound, bound)
        b2 = jax.random.uniform(k4, (channels,), jnp.float32, -bound, bound)

        def kio(w):   # (C_out, C_in, K) -> (K, C_in, C_out): per-tap (C, C) matrices
            return jnp.transpose(w, (2, 1, 0))

        params.append(dict(
            K=kernel_size, d=d,
            w1_kio=kio(w1).astype(matmul_dtype), b1_row=b1.reshape(1, channels),
            w2_kio=kio(w2).astype(matmul_dtype), b2_row=b2.reshape(1, channels),
            # f32 NCL copies for the pure-JAX reference
            w1_ncl=w1, b1_vec=b1, w2_ncl=w2, b2_vec=b2,
        ))
    return params


def ref_forward(x_ncl, mask_ncl, params):
    """Pure-JAX f32 reference matching the PyTorch forward (NCL layout)."""
    def conv(v, w, b, d):
        Kk = w.shape[-1]
        pad = (Kk * d - d) // 2
        y = jax.lax.conv_general_dilated(
            v, w, window_strides=(1,), padding=[(pad, pad)], rhs_dilation=(d,),
            dimension_numbers=("NCH", "OIH", "NCH"),
            precision=jax.lax.Precision.HIGHEST)
        return y + b[None, :, None]

    h = x_ncl
    for p in params:
        t = conv(_leaky_relu(h) * mask_ncl, p["w1_ncl"], p["b1_vec"], p["d"])
        t = conv(_leaky_relu(t) * mask_ncl, p["w2_ncl"], p["b2_vec"], 1)
        h = t + h
    return h * mask_ncl


if __name__ == "__main__":
    key = jax.random.PRNGKey(0)
    kx, kp = jax.random.split(key, 2)

    N, C, T = 2, 4, 48
    kernel_size, dilations = 3, (1, 3, 5)

    # PyTorch-convention inputs: x is NCL, x_mask is (N, 1, T) built from lengths.
    x_ncl = jax.random.normal(kx, (N, C, T), jnp.float32)
    lengths = jnp.array([T, T - 11], jnp.int32)
    mask_ncl = (jnp.arange(T)[None, None, :] < lengths[:, None, None]).astype(jnp.float32)

    params = init_params(kp, C, kernel_size, dilations)

    # Kernel layout: NTC; small time_tile so the test exercises the multi-tile halo path
    # (fused halo = 16 rows, tt = 16, nT = 3) plus both sequence-edge and mask handling.
    x_ntc = jnp.transpose(x_ncl, (0, 2, 1))
    out_ntc = resblock_forward(x_ntc, lengths, params, time_tile=16)
    out_ncl = jnp.transpose(out_ntc, (0, 2, 1))
    jax.block_until_ready(out_ncl)

    ref = ref_forward(x_ncl, mask_ncl, params)
    err = float(jnp.max(jnp.abs(out_ncl - ref)))
    # Tolerance accounts for bf16 MXU operands (f32 accumulation, f32 residual path)
    # vs the f32 reference across three residual stages.
    assert err < 5e-3, err

    print("KERNEL_OK")
</pallas_src>

<mosaic_0001>
module attributes {stable_mosaic.version = 11 : i64} {
  func.func @_resblock_kernel(%arg0: i32, %arg1: i32, %arg2: memref<2xi32, #tpu.memory_space<smem>>, %arg3: memref<1x16x4xf32, #tpu.memory_space<vmem>>, %arg4: memref<1x1x16x4xf32, #tpu.memory_space<vmem>>, %arg5: memref<1x1x16x4xf32, #tpu.memory_space<vmem>>, %arg6: memref<3x4x4xbf16, #tpu.memory_space<vmem>>, %arg7: memref<1x4xf32, #tpu.memory_space<vmem>>, %arg8: memref<3x4x4xbf16, #tpu.memory_space<vmem>>, %arg9: memref<1x4xf32, #tpu.memory_space<vmem>>, %arg10: memref<3x4x4xbf16, #tpu.memory_space<vmem>>, %arg11: memref<1x4xf32, #tpu.memory_space<vmem>>, %arg12: memref<3x4x4xbf16, #tpu.memory_space<vmem>>, %arg13: memref<1x4xf32, #tpu.memory_space<vmem>>, %arg14: memref<3x4x4xbf16, #tpu.memory_space<vmem>>, %arg15: memref<1x4xf32, #tpu.memory_space<vmem>>, %arg16: memref<3x4x4xbf16, #tpu.memory_space<vmem>>, %arg17: memref<1x4xf32, #tpu.memory_space<vmem>>, %arg18: memref<1x16x4xf32, #tpu.memory_space<vmem>>) attributes {dimension_semantics = [#tpu.dimension_semantics<parallel>, #tpu.dimension_semantics<parallel>], iteration_bounds = array<i64: 3, 2>, scalar_prefetch = 1 : i64, scratch_operands = 0 : i64, tpu.core_type = #tpu.core_type<tc>, window_params = [{transform_indices = @transform_0, window_bounds = array<i64: 1, 16, 4>}, {transform_indices = @transform_1, window_bounds = array<i64: 1, 1, 16, 4>}, {transform_indices = @transform_2, window_bounds = array<i64: 1, 1, 16, 4>}, {pipeline_mode = #tpu.pipeline_mode<synchronous>, transform_indices = @transform_3, window_bounds = array<i64: 3, 4, 4>}, {pipeline_mode = #tpu.pipeline_mode<synchronous>, transform_indices = @transform_4, window_bounds = array<i64: 1, 4>}, {pipeline_mode = #tpu.pipeline_mode<synchronous>, transform_indices = @transform_5, window_bounds = array<i64: 3, 4, 4>}, {pipeline_mode = #tpu.pipeline_mode<synchronous>, transform_indices = @transform_6, window_bounds = array<i64: 1, 4>}, {pipeline_mode = #tpu.pipeline_mode<synchronous>, transform_indices = @transform_7, window_bounds = array<i64: 3, 4, 4>}, {pipeline_mode = #tpu.pipeline_mode<synchronous>, transform_indices = @transform_8, window_bounds = array<i64: 1, 4>}, {pipeline_mode = #tpu.pipeline_mode<synchronous>, transform_indices = @transform_9, window_bounds = array<i64: 3, 4, 4>}, {pipeline_mode = #tpu.pipeline_mode<synchronous>, transform_indices = @transform_10, window_bounds = array<i64: 1, 4>}, {pipeline_mode = #tpu.pipeline_mode<synchronous>, transform_indices = @transform_11, window_bounds = array<i64: 3, 4, 4>}, {pipeline_mode = #tpu.pipeline_mode<synchronous>, transform_indices = @transform_12, window_bounds = array<i64: 1, 4>}, {pipeline_mode = #tpu.pipeline_mode<synchronous>, transform_indices = @transform_13, window_bounds = array<i64: 3, 4, 4>}, {pipeline_mode = #tpu.pipeline_mode<synchronous>, transform_indices = @transform_14, window_bounds = array<i64: 1, 4>}, {transform_indices = @transform_15, window_bounds = array<i64: 1, 16, 4>}]} {
    %0 = arith.index_cast %arg1 : i32 to index
    %1 = memref.load %arg2[%0] : memref<2xi32, #tpu.memory_space<smem>>
    %c16_i32 = arith.constant 16 : i32
    %2 = arith.muli %arg0, %c16_i32 : i32
    %c0 = arith.constant 0 : index
    %c0_0 = arith.constant 0 : index
    %c0_1 = arith.constant 0 : index
    %c0_2 = arith.constant 0 : index
    %3 = vector.load %arg4[%c0, %c0_0, %c0_1, %c0_2] : memref<1x1x16x4xf32, #tpu.memory_space<vmem>>, vector<1x1x16x4xf32>
    %4 = vector.shape_cast %3 : vector<1x1x16x4xf32> to vector<16x4xf32>
    %c0_3 = arith.constant 0 : index
    %c0_4 = arith.constant 0 : index
    %c0_5 = arith.constant 0 : index
    %5 = vector.load %arg3[%c0_3, %c0_4, %c0_5] : memref<1x16x4xf32, #tpu.memory_space<vmem>>, vector<1x16x4xf32>
    %6 = vector.shape_cast %5 : vector<1x16x4xf32> to vector<16x4xf32>
    %c0_6 = arith.constant 0 : index
    %c0_7 = arith.constant 0 : index
    %c0_8 = arith.constant 0 : index
    %c0_9 = arith.constant 0 : index
    %7 = vector.load %arg5[%c0_6, %c0_7, %c0_8, %c0_9] : memref<1x1x16x4xf32, #tpu.memory_space<vmem>>, vector<1x1x16x4xf32>
    %8 = vector.shape_cast %7 : vector<1x1x16x4xf32> to vector<16x4xf32>
    %9 = tpu.concatenate %4, %6, %8 in 0 : vector<16x4xf32>, vector<16x4xf32>, vector<16x4xf32> -> vector<48x4xf32>
    %10 = tpu.iota {dimensions = array<i32: 0>} : vector<48x1xi32>
    %c16_i32_10 = arith.constant 16 : i32
    %11 = arith.subi %2, %c16_i32_10 : i32
    %12 = vector.broadcast %11 : i32 to vector<48x1xi32>
    %13 = arith.addi %10, %12 : vector<48x1xi32>
    %c0_i32 = arith.constant 0 : i32
    %14 = vector.broadcast %c0_i32 : i32 to vector<48x1xi32>
    %15 = arith.cmpi sge, %13, %14 : vector<48x1xi32>
    %16 = vector.broadcast %1 : i32 to vector<48x1xi32>
    %17 = arith.cmpi slt, %13, %16 : vector<48x1xi32>
    %18 = arith.andi %15, %17 : vector<48x1xi1>
    %c0_11 = arith.constant 0 : index
    %c0_12 = arith.constant 0 : index
    %c0_13 = arith.constant 0 : index
    %19 = vector.load %arg6[%c0_11, %c0_12, %c0_13] : memref<3x4x4xbf16, #tpu.memory_space<vmem>>, vector<3x4x4xbf16>
    %c0_14 = arith.constant 0 : index
    %c0_15 = arith.constant 0 : index
    %20 = vector.load %arg7[%c0_14, %c0_15] : memref<1x4xf32, #tpu.memory_space<vmem>>, vector<1x4xf32>
    %c0_16 = arith.constant 0 : index
    %c0_17 = arith.constant 0 : index
    %c0_18 = arith.constant 0 : index
    %21 = vector.load %arg8[%c0_16, %c0_17, %c0_18] : memref<3x4x4xbf16, #tpu.memory_space<vmem>>, vector<3x4x4xbf16>
    %c0_19 = arith.constant 0 : index
    %c0_20 = arith.constant 0 : index
    %22 = vector.load %arg9[%c0_19, %c0_20] : memref<1x4xf32, #tpu.memory_space<vmem>>, vector<1x4xf32>
    %cst = arith.constant 0.000000e+00 : f32
    %23 = vector.broadcast %cst : f32 to vector<48x4xf32>
    %24 = arith.cmpf oge, %9, %23 : vector<48x4xf32>
    %cst_21 = arith.constant 1.000000e-01 : f32
    %25 = vector.broadcast %cst_21 : f32 to vector<48x4xf32>
    %26 = arith.mulf %25, %9 : vector<48x4xf32>
    %27 = arith.select %24, %9, %26 : vector<48x4xi1>, vector<48x4xf32>
    %cst_22 = arith.constant 0.000000e+00 : f32
    %28 = vector.shape_cast %18 : vector<48x1xi1> to vector<48x1xi1>
    %29 = vector.broadcast %28 : vector<48x1xi1> to vector<48x4xi1>
    %30 = vector.broadcast %cst_22 : f32 to vector<48x4xf32>
    %31 = arith.select %29, %27, %30 : vector<48x4xi1>, vector<48x4xf32>
    %32 = arith.truncf %31 : vector<48x4xf32> to vector<48x4xbf16>
    %33 = vector.extract_strided_slice %32 {offsets = [2, 0], sizes = [42, 4], strides = [1, 1]} : vector<48x4xbf16> to vector<42x4xbf16>
    %34 = vector.extract_strided_slice %19 {offsets = [0, 0, 0], sizes = [1, 4, 4], strides = [1, 1, 1]} : vector<3x4x4xbf16> to vector<1x4x4xbf16>
    %35 = vector.shape_cast %34 : vector<1x4x4xbf16> to vector<4x4xbf16>
    %cst_23 = arith.constant dense<0.000000e+00> : vector<42x4xf32>
    %36 = tpu.matmul %33, %35, %cst_23 {dimension_numbers = #tpu.dot_dimension_numbers<[1], [0], [0], [1], [0, 0, 1, 1], [], []>} : vector<42x4xbf16>, vector<4x4xbf16>, vector<42x4xf32> -> vector<42x4xf32>
    %37 = vector.broadcast %20 : vector<1x4xf32> to vector<42x4xf32>
    %38 = arith.addf %37, %36 : vector<42x4xf32>
    %39 = vector.extract_strided_slice %32 {offsets = [3, 0], sizes = [42, 4], strides = [1, 1]} : vector<48x4xbf16> to vector<42x4xbf16>
    %40 = vector.extract_strided_slice %19 {offsets = [1, 0, 0], sizes = [1, 4, 4], strides = [1, 1, 1]} : vector<3x4x4xbf16> to vector<1x4x4xbf16>
    %41 = vector.shape_cast %40 : vector<1x4x4xbf16> to vector<4x4xbf16>
    %cst_24 = arith.constant dense<0.000000e+00> : vector<42x4xf32>
    %42 = tpu.matmul %39, %41, %cst_24 {dimension_numbers = #tpu.dot_dimension_numbers<[1], [0], [0], [1], [0, 0, 1, 1], [], []>} : vector<42x4xbf16>, vector<4x4xbf16>, vector<42x4xf32> -> vector<42x4xf32>
    %43 = arith.addf %38, %42 : vector<42x4xf32>
    %44 = vector.extract_strided_slice %32 {offsets = [4, 0], sizes = [42, 4], strides = [1, 1]} : vector<48x4xbf16> to vector<42x4xbf16>
    %45 = vector.extract_strided_slice %19 {offsets = [2, 0, 0], sizes = [1, 4, 4], strides = [1, 1, 1]} : vector<3x4x4xbf16> to vector<1x4x4xbf16>
    %46 = vector.shape_cast %45 : vector<1x4x4xbf16> to vector<4x4xbf16>
    %cst_25 = arith.constant dense<0.000000e+00> : vector<42x4xf32>
    %47 = tpu.matmul %44, %46, %cst_25 {dimension_numbers = #tpu.dot_dimension_numbers<[1], [0], [0], [1], [0, 0, 1, 1], [], []>} : vector<42x4xbf16>, vector<4x4xbf16>, vector<42x4xf32> -> vector<42x4xf32>
    %48 = arith.addf %43, %47 : vector<42x4xf32>
    %49 = vector.extract_strided_slice %18 {offsets = [3, 0], sizes = [42, 1], strides = [1, 1]} : vector<48x1xi1> to vector<42x1xi1>
    %cst_26 = arith.constant 0.000000e+00 : f32
    %50 = vector.broadcast %cst_26 : f32 to vector<42x4xf32>
    %51 = arith.cmpf oge, %48, %50 : vector<42x4xf32>
    %cst_27 = arith.constant 1.000000e-01 : f32
    %52 = vector.broadcast %cst_27 : f32 to vector<42x4xf32>
    %53 = arith.mulf %52, %48 : vector<42x4xf32>
    %54 = arith.select %51, %48, %53 : vector<42x4xi1>, vector<42x4xf32>
    %cst_28 = arith.constant 0.000000e+00 : f32
    %55 = vector.shape_cast %49 : vector<42x1xi1> to vector<42x1xi1>
    %56 = vector.broadcast %55 : vector<42x1xi1> to vector<42x4xi1>
    %57 = vector.broadcast %cst_28 : f32 to vector<42x4xf32>
    %58 = arith.select %56, %54, %57 : vector<42x4xi1>, vector<42x4xf32>
    %59 = arith.truncf %58 : vector<42x4xf32> to vector<42x4xbf16>
    %60 = vector.extract_strided_slice %59 {offsets = [0, 0], sizes = [40, 4], strides = [1, 1]} : vector<42x4xbf16> to vector<40x4xbf16>
    %61 = vector.extract_strided_slice %21 {offsets = [0, 0, 0], sizes = [1, 4, 4], strides = [1, 1, 1]} : vector<3x4x4xbf16> to vector<1x4x4xbf16>
    %62 = vector.shape_cast %61 : vector<1x4x4xbf16> to vector<4x4xbf16>
    %cst_29 = arith.constant dense<0.000000e+00> : vector<40x4xf32>
    %63 = tpu.matmul %60, %62, %cst_29 {dimension_numbers = #tpu.dot_dimension_numbers<[1], [0], [0], [1], [0, 0, 1, 1], [], []>} : vector<40x4xbf16>, vector<4x4xbf16>, vector<40x4xf32> -> vector<40x4xf32>
    %64 = vector.broadcast %22 : vector<1x4xf32> to vector<40x4xf32>
    %65 = arith.addf %64, %63 : vector<40x4xf32>
    %66 = vector.extract_strided_slice %59 {offsets = [1, 0], sizes = [40, 4], strides = [1, 1]} : vector<42x4xbf16> to vector<40x4xbf16>
    %67 = vector.extract_strided_slice %21 {offsets = [1, 0, 0], sizes = [1, 4, 4], strides = [1, 1, 1]} : vector<3x4x4xbf16> to vector<1x4x4xbf16>
    %68 = vector.shape_cast %67 : vector<1x4x4xbf16> to vector<4x4xbf16>
    %cst_30 = arith.constant dense<0.000000e+00> : vector<40x4xf32>
    %69 = tpu.matmul %66, %68, %cst_30 {dimension_numbers = #tpu.dot_dimension_numbers<[1], [0], [0], [1], [0, 0, 1, 1], [], []>} : vector<40x4xbf16>, vector<4x4xbf16>, vector<40x4xf32> -> vector<40x4xf32>
    %70 = arith.addf %65, %69 : vector<40x4xf32>
    %71 = vector.extract_strided_slice %59 {offsets = [2, 0], sizes = [40, 4], strides = [1, 1]} : vector<42x4xbf16> to vector<40x4xbf16>
    %72 = vector.extract_strided_slice %21 {offsets = [2, 0, 0], sizes = [1, 4, 4], strides = [1, 1, 1]} : vector<3x4x4xbf16> to vector<1x4x4xbf16>
    %73 = vector.shape_cast %72 : vector<1x4x4xbf16> to vector<4x4xbf16>
    %cst_31 = arith.constant dense<0.000000e+00> : vector<40x4xf32>
    %74 = tpu.matmul %71, %73, %cst_31 {dimension_numbers = #tpu.dot_dimension_numbers<[1], [0], [0], [1], [0, 0, 1, 1], [], []>} : vector<40x4xbf16>, vector<4x4xbf16>, vector<40x4xf32> -> vector<40x4xf32>
    %75 = arith.addf %70, %74 : vector<40x4xf32>
    %76 = vector.extract_strided_slice %9 {offsets = [4, 0], sizes = [40, 4], strides = [1, 1]} : vector<48x4xf32> to vector<40x4xf32>
    %77 = arith.addf %75, %76 : vector<40x4xf32>
    %c0_32 = arith.constant 0 : index
    %c0_33 = arith.constant 0 : index
    %c0_34 = arith.constant 0 : index
    %78 = vector.load %arg10[%c0_32, %c0_33, %c0_34] : memref<3x4x4xbf16, #tpu.memory_space<vmem>>, vector<3x4x4xbf16>
    %c0_35 = arith.constant 0 : index
    %c0_36 = arith.constant 0 : index
    %79 = vector.load %arg11[%c0_35, %c0_36] : memref<1x4xf32, #tpu.memory_space<vmem>>, vector<1x4xf32>
    %c0_37 = arith.constant 0 : index
    %c0_38 = arith.constant 0 : index
    %c0_39 = arith.constant 0 : index
    %80 = vector.load %arg12[%c0_37, %c0_38, %c0_39] : memref<3x4x4xbf16, #tpu.memory_space<vmem>>, vector<3x4x4xbf16>
    %c0_40 = arith.constant 0 : index
    %c0_41 = arith.constant 0 : index
    %81 = vector.load %arg13[%c0_40, %c0_41] : memref<1x4xf32, #tpu.memory_space<vmem>>, vector<1x4xf32>
    %82 = vector.extract_strided_slice %18 {offsets = [4, 0], sizes = [40, 1], strides = [1, 1]} : vector<48x1xi1> to vector<40x1xi1>
    %cst_42 = arith.constant 0.000000e+00 : f32
    %83 = vector.broadcast %cst_42 : f32 to vector<40x4xf32>
    %84 = arith.cmpf oge, %77, %83 : vector<40x4xf32>
    %cst_43 = arith.constant 1.000000e-01 : f32
    %85 = vector.broadcast %cst_43 : f32 to vector<40x4xf32>
    %86 = arith.mulf %85, %77 : vector<40x4xf32>
    %87 = arith.select %84, %77, %86 : vector<40x4xi1>, vector<40x4xf32>
    %cst_44 = arith.constant 0.000000e+00 : f32
    %88 = vector.shape_cast %82 : vector<40x1xi1> to vector<40x1xi1>
    %89 = vector.broadcast %88 : vector<40x1xi1> to vector<40x4xi1>
    %90 = vector.broadcast %cst_44 : f32 to vector<40x4xf32>
    %91 = arith.select %89, %87, %90 : vector<40x4xi1>, vector<40x4xf32>
    %92 = arith.truncf %91 : vector<40x4xf32> to vector<40x4xbf16>
    %93 = vector.extract_strided_slice %92 {offsets = [0, 0], sizes = [34, 4], strides = [1, 1]} : vector<40x4xbf16> to vector<34x4xbf16>
    %94 = vector.extract_strided_slice %78 {offsets = [0, 0, 0], sizes = [1, 4, 4], strides = [1, 1, 1]} : vector<3x4x4xbf16> to vector<1x4x4xbf16>
    %95 = vector.shape_cast %94 : vector<1x4x4xbf16> to vector<4x4xbf16>
    %cst_45 = arith.constant dense<0.000000e+00> : vector<34x4xf32>
    %96 = tpu.matmul %93, %95, %cst_45 {dimension_numbers = #tpu.dot_dimension_numbers<[1], [0], [0], [1], [0, 0, 1, 1], [], []>} : vector<34x4xbf16>, vector<4x4xbf16>, vector<34x4xf32> -> vector<34x4xf32>
    %97 = vector.broadcast %79 : vector<1x4xf32> to vector<34x4xf32>
    %98 = arith.addf %97, %96 : vector<34x4xf32>
    %99 = vector.extract_strided_slice %92 {offsets = [3, 0], sizes = [34, 4], strides = [1, 1]} : vector<40x4xbf16> to vector<34x4xbf16>
    %100 = vector.extract_strided_slice %78 {offsets = [1, 0, 0], sizes = [1, 4, 4], strides = [1, 1, 1]} : vector<3x4x4xbf16> to vector<1x4x4xbf16>
    %101 = vector.shape_cast %100 : vector<1x4x4xbf16> to vector<4x4xbf16>
    %cst_46 = arith.constant dense<0.000000e+00> : vector<34x4xf32>
    %102 = tpu.matmul %99, %101, %cst_46 {dimension_numbers = #tpu.dot_dimension_numbers<[1], [0], [0], [1], [0, 0, 1, 1], [], []>} : vector<34x4xbf16>, vector<4x4xbf16>, vector<34x4xf32> -> vector<34x4xf32>
    %103 = arith.addf %98, %102 : vector<34x4xf32>
    %104 = vector.extract_strided_slice %92 {offsets = [6, 0], sizes = [34, 4], strides = [1, 1]} : vector<40x4xbf16> to vector<34x4xbf16>
    %105 = vector.extract_strided_slice %78 {offsets = [2, 0, 0], sizes = [1, 4, 4], strides = [1, 1, 1]} : vector<3x4x4xbf16> to vector<1x4x4xbf16>
    %106 = vector.shape_cast %105 : vector<1x4x4xbf16> to vector<4x4xbf16>
    %cst_47 = arith.constant dense<0.000000e+00> : vector<34x4xf32>
    %107 = tpu.matmul %104, %106, %cst_47 {dimension_numbers = #tpu.dot_dimension_numbers<[1], [0], [0], [1], [0, 0, 1, 1], [], []>} : vector<34x4xbf16>, vector<4x4xbf16>, vector<34x4xf32> -> vector<34x4xf32>
    %108 = arith.addf %103, %107 : vector<34x4xf32>
    %109 = vector.extract_strided_slice %18 {offsets = [7, 0], sizes = [34, 1], strides = [1, 1]} : vector<48x1xi1> to vector<34x1xi1>
    %cst_48 = arith.constant 0.000000e+00 : f32
    %110 = vector.broadcast %cst_48 : f32 to vector<34x4xf32>
    %111 = arith.cmpf oge, %108, %110 : vector<34x4xf32>
    %cst_49 = arith.constant 1.000000e-01 : f32
    %112 = vector.broadcast %cst_49 : f32 to vector<34x4xf32>
    %113 = arith.mulf %112, %108 : vector<34x4xf32>
    %114 = arith.select %111, %108, %113 : vector<34x4xi1>, vector<34x4xf32>
    %cst_50 = arith.constant 0.000000e+00 : f32
    %115 = vector.shape_cast %109 : vector<34x1xi1> to vector<34x1xi1>
    %116 = vector.broadcast %115 : vector<34x1xi1> to vector<34x4xi1>
    %117 = vector.broadcast %cst_50 : f32 to vector<34x4xf32>
    %118 = arith.select %116, %114, %117 : vector<34x4xi1>, vector<34x4xf32>
    %119 = arith.truncf %118 : vector<34x4xf32> to vector<34x4xbf16>
    %120 = vector.extract_strided_slice %119 {offsets = [0, 0], sizes = [32, 4], strides = [1, 1]} : vector<34x4xbf16> to vector<32x4xbf16>
    %121 = vector.extract_strided_slice %80 {offsets = [0, 0, 0], sizes = [1, 4, 4], strides = [1, 1, 1]} : vector<3x4x4xbf16> to vector<1x4x4xbf16>
    %122 = vector.shape_cast %121 : vector<1x4x4xbf16> to vector<4x4xbf16>
    %cst_51 = arith.constant dense<0.000000e+00> : vector<32x4xf32>
    %123 = tpu.matmul %120, %122, %cst_51 {dimension_numbers = #tpu.dot_dimension_numbers<[1], [0], [0], [1], [0, 0, 1, 1], [], []>} : vector<32x4xbf16>, vector<4x4xbf16>, vector<32x4xf32> -> vector<32x4xf32>
    %124 = vector.broadcast %81 : vector<1x4xf32> to vector<32x4xf32>
    %125 = arith.addf %124, %123 : vector<32x4xf32>
    %126 = vector.extract_strided_slice %119 {offsets = [1, 0], sizes = [32, 4], strides = [1, 1]} : vector<34x4xbf16> to vector<32x4xbf16>
    %127 = vector.extract_strided_slice %80 {offsets = [1, 0, 0], sizes = [1, 4, 4], strides = [1, 1, 1]} : vector<3x4x4xbf16> to vector<1x4x4xbf16>
    %128 = vector.shape_cast %127 : vector<1x4x4xbf16> to vector<4x4xbf16>
    %cst_52 = arith.constant dense<0.000000e+00> : vector<32x4xf32>
    %129 = tpu.matmul %126, %128, %cst_52 {dimension_numbers = #tpu.dot_dimension_numbers<[1], [0], [0], [1], [0, 0, 1, 1], [], []>} : vector<32x4xbf16>, vector<4x4xbf16>, vector<32x4xf32> -> vector<32x4xf32>
    %130 = arith.addf %125, %129 : vector<32x4xf32>
    %131 = vector.extract_strided_slice %119 {offsets = [2, 0], sizes = [32, 4], strides = [1, 1]} : vector<34x4xbf16> to vector<32x4xbf16>
    %132 = vector.extract_strided_slice %80 {offsets = [2, 0, 0], sizes = [1, 4, 4], strides = [1, 1, 1]} : vector<3x4x4xbf16> to vector<1x4x4xbf16>
    %133 = vector.shape_cast %132 : vector<1x4x4xbf16> to vector<4x4xbf16>
    %cst_53 = arith.constant dense<0.000000e+00> : vector<32x4xf32>
    %134 = tpu.matmul %131, %133, %cst_53 {dimension_numbers = #tpu.dot_dimension_numbers<[1], [0], [0], [1], [0, 0, 1, 1], [], []>} : vector<32x4xbf16>, vector<4x4xbf16>, vector<32x4xf32> -> vector<32x4xf32>
    %135 = arith.addf %130, %134 : vector<32x4xf32>
    %136 = vector.extract_strided_slice %77 {offsets = [4, 0], sizes = [32, 4], strides = [1, 1]} : vector<40x4xf32> to vector<32x4xf32>
    %137 = arith.addf %135, %136 : vector<32x4xf32>
    %c0_54 = arith.constant 0 : index
    %c0_55 = arith.constant 0 : index
    %c0_56 = arith.constant 0 : index
    %138 = vector.load %arg14[%c0_54, %c0_55, %c0_56] : memref<3x4x4xbf16, #tpu.memory_space<vmem>>, vector<3x4x4xbf16>
    %c0_57 = arith.constant 0 : index
    %c0_58 = arith.constant 0 : index
    %139 = vector.load %arg15[%c0_57, %c0_58] : memref<1x4xf32, #tpu.memory_space<vmem>>, vector<1x4xf32>
    %c0_59 = arith.constant 0 : index
    %c0_60 = arith.constant 0 : index
    %c0_61 = arith.constant 0 : index
    %140 = vector.load %arg16[%c0_59, %c0_60, %c0_61] : memref<3x4x4xbf16, #tpu.memory_space<vmem>>, vector<3x4x4xbf16>
    %c0_62 = arith.constant 0 : index
    %c0_63 = arith.constant 0 : index
    %141 = vector.load %arg17[%c0_62, %c0_63] : memref<1x4xf32, #tpu.memory_space<vmem>>, vector<1x4xf32>
    %142 = vector.extract_strided_slice %18 {offsets = [8, 0], sizes = [32, 1], strides = [1, 1]} : vector<48x1xi1> to vector<32x1xi1>
    %cst_64 = arith.constant 0.000000e+00 : f32
    %143 = vector.broadcast %cst_64 : f32 to vector<32x4xf32>
    %144 = arith.cmpf oge, %137, %143 : vector<32x4xf32>
    %cst_65 = arith.constant 1.000000e-01 : f32
    %145 = vector.broadcast %cst_65 : f32 to vector<32x4xf32>
    %146 = arith.mulf %145, %137 : vector<32x4xf32>
    %147 = arith.select %144, %137, %146 : vector<32x4xi1>, vector<32x4xf32>
    %cst_66 = arith.constant 0.000000e+00 : f32
    %148 = vector.shape_cast %142 : vector<32x1xi1> to vector<32x1xi1>
    %149 = vector.broadcast %148 : vector<32x1xi1> to vector<32x4xi1>
    %150 = vector.broadcast %cst_66 : f32 to vector<32x4xf32>
    %151 = arith.select %149, %147, %150 : vector<32x4xi1>, vector<32x4xf32>
    %152 = arith.truncf %151 : vector<32x4xf32> to vector<32x4xbf16>
    %153 = vector.extract_strided_slice %152 {offsets = [2, 0], sizes = [18, 4], strides = [1, 1]} : vector<32x4xbf16> to vector<18x4xbf16>
    %154 = vector.extract_strided_slice %138 {offsets = [0, 0, 0], sizes = [1, 4, 4], strides = [1, 1, 1]} : vector<3x4x4xbf16> to vector<1x4x4xbf16>
    %155 = vector.shape_cast %154 : vector<1x4x4xbf16> to vector<4x4xbf16>
    %cst_67 = arith.constant dense<0.000000e+00> : vector<18x4xf32>
    %156 = tpu.matmul %153, %155, %cst_67 {dimension_numbers = #tpu.dot_dimension_numbers<[1], [0], [0], [1], [0, 0, 1, 1], [], []>} : vector<18x4xbf16>, vector<4x4xbf16>, vector<18x4xf32> -> vector<18x4xf32>
    %157 = vector.broadcast %139 : vector<1x4xf32> to vector<18x4xf32>
    %158 = arith.addf %157, %156 : vector<18x4xf32>
    %159 = vector.extract_strided_slice %152 {offsets = [7, 0], sizes = [18, 4], strides = [1, 1]} : vector<32x4xbf16> to vector<18x4xbf16>
    %160 = vector.extract_strided_slice %138 {offsets = [1, 0, 0], sizes = [1, 4, 4], strides = [1, 1, 1]} : vector<3x4x4xbf16> to vector<1x4x4xbf16>
    %161 = vector.shape_cast %160 : vector<1x4x4xbf16> to vector<4x4xbf16>
    %cst_68 = arith.constant dense<0.000000e+00> : vector<18x4xf32>
    %162 = tpu.matmul %159, %161, %cst_68 {dimension_numbers = #tpu.dot_dimension_numbers<[1], [0], [0], [1], [0, 0, 1, 1], [], []>} : vector<18x4xbf16>, vector<4x4xbf16>, vector<18x4xf32> -> vector<18x4xf32>
    %163 = arith.addf %158, %162 : vector<18x4xf32>
    %164 = vector.extract_strided_slice %152 {offsets = [12, 0], sizes = [18, 4], strides = [1, 1]} : vector<32x4xbf16> to vector<18x4xbf16>
    %165 = vector.extract_strided_slice %138 {offsets = [2, 0, 0], sizes = [1, 4, 4], strides = [1, 1, 1]} : vector<3x4x4xbf16> to vector<1x4x4xbf16>
    %166 = vector.shape_cast %165 : vector<1x4x4xbf16> to vector<4x4xbf16>
    %cst_69 = arith.constant dense<0.000000e+00> : vector<18x4xf32>
    %167 = tpu.matmul %164, %166, %cst_69 {dimension_numbers = #tpu.dot_dimension_numbers<[1], [0], [0], [1], [0, 0, 1, 1], [], []>} : vector<18x4xbf16>, vector<4x4xbf16>, vector<18x4xf32> -> vector<18x4xf32>
    %168 = arith.addf %163, %167 : vector<18x4xf32>
    %169 = vector.extract_strided_slice %18 {offsets = [15, 0], sizes = [18, 1], strides = [1, 1]} : vector<48x1xi1> to vector<18x1xi1>
    %cst_70 = arith.constant 0.000000e+00 : f32
    %170 = vector.broadcast %cst_70 : f32 to vector<18x4xf32>
    %171 = arith.cmpf oge, %168, %170 : vector<18x4xf32>
    %cst_71 = arith.constant 1.000000e-01 : f32
    %172 = vector.broadcast %cst_71 : f32 to vector<18x4xf32>
    %173 = arith.mulf %172, %168 : vector<18x4xf32>
    %174 = arith.select %171, %168, %173 : vector<18x4xi1>, vector<18x4xf32>
    %cst_72 = arith.constant 0.000000e+00 : f32
    %175 = vector.shape_cast %169 : vector<18x1xi1> to vector<18x1xi1>
    %176 = vector.broadcast %175 : vector<18x1xi1> to vector<18x4xi1>
    %177 = vector.broadcast %cst_72 : f32 to vector<18x4xf32>
    %178 = arith.select %176, %174, %177 : vector<18x4xi1>, vector<18x4xf32>
    %179 = arith.truncf %178 : vector<18x4xf32> to vector<18x4xbf16>
    %180 = vector.extract_strided_slice %179 {offsets = [0, 0], sizes = [16, 4], strides = [1, 1]} : vector<18x4xbf16> to vector<16x4xbf16>
    %181 = vector.extract_strided_slice %140 {offsets = [0, 0, 0], sizes = [1, 4, 4], strides = [1, 1, 1]} : vector<3x4x4xbf16> to vector<1x4x4xbf16>
    %182 = vector.shape_cast %181 : vector<1x4x4xbf16> to vector<4x4xbf16>
    %cst_73 = arith.constant dense<0.000000e+00> : vector<16x4xf32>
    %183 = tpu.matmul %180, %182, %cst_73 {dimension_numbers = #tpu.dot_dimension_numbers<[1], [0], [0], [1], [0, 0, 1, 1], [], []>} : vector<16x4xbf16>, vector<4x4xbf16>, vector<16x4xf32> -> vector<16x4xf32>
    %184 = vector.broadcast %141 : vector<1x4xf32> to vector<16x4xf32>
    %185 = arith.addf %184, %183 : vector<16x4xf32>
    %186 = vector.extract_strided_slice %179 {offsets = [1, 0], sizes = [16, 4], strides = [1, 1]} : vector<18x4xbf16> to vector<16x4xbf16>
    %187 = vector.extract_strided_slice %140 {offsets = [1, 0, 0], sizes = [1, 4, 4], strides = [1, 1, 1]} : vector<3x4x4xbf16> to vector<1x4x4xbf16>
    %188 = vector.shape_cast %187 : vector<1x4x4xbf16> to vector<4x4xbf16>
    %cst_74 = arith.constant dense<0.000000e+00> : vector<16x4xf32>
    %189 = tpu.matmul %186, %188, %cst_74 {dimension_numbers = #tpu.dot_dimension_numbers<[1], [0], [0], [1], [0, 0, 1, 1], [], []>} : vector<16x4xbf16>, vector<4x4xbf16>, vector<16x4xf32> -> vector<16x4xf32>
    %190 = arith.addf %185, %189 : vector<16x4xf32>
    %191 = vector.extract_strided_slice %179 {offsets = [2, 0], sizes = [16, 4], strides = [1, 1]} : vector<18x4xbf16> to vector<16x4xbf16>
    %192 = vector.extract_strided_slice %140 {offsets = [2, 0, 0], sizes = [1, 4, 4], strides = [1, 1, 1]} : vector<3x4x4xbf16> to vector<1x4x4xbf16>
    %193 = vector.shape_cast %192 : vector<1x4x4xbf16> to vector<4x4xbf16>
    %cst_75 = arith.constant dense<0.000000e+00> : vector<16x4xf32>
    %194 = tpu.matmul %191, %193, %cst_75 {dimension_numbers = #tpu.dot_dimension_numbers<[1], [0], [0], [1], [0, 0, 1, 1], [], []>} : vector<16x4xbf16>, vector<4x4xbf16>, vector<16x4xf32> -> vector<16x4xf32>
    %195 = arith.addf %190, %194 : vector<16x4xf32>
    %196 = vector.extract_strided_slice %137 {offsets = [8, 0], sizes = [16, 4], strides = [1, 1]} : vector<32x4xf32> to vector<16x4xf32>
    %197 = arith.addf %195, %196 : vector<16x4xf32>
    %198 = vector.extract_strided_slice %18 {offsets = [16, 0], sizes = [16, 1], strides = [1, 1]} : vector<48x1xi1> to vector<16x1xi1>
    %cst_76 = arith.constant 0.000000e+00 : f32
    %199 = vector.shape_cast %198 : vector<16x1xi1> to vector<16x1xi1>
    %200 = vector.broadcast %199 : vector<16x1xi1> to vector<16x4xi1>
    %201 = vector.broadcast %cst_76 : f32 to vector<16x4xf32>
    %202 = arith.select %200, %197, %201 : vector<16x4xi1>, vector<16x4xf32>
    %c0_77 = arith.constant 0 : index
    %c0_78 = arith.constant 0 : index
    %c0_79 = arith.constant 0 : index
    %203 = vector.load %arg18[%c0_77, %c0_78, %c0_79] : memref<1x16x4xf32, #tpu.memory_space<vmem>>, vector<1x16x4xf32>
    %204 = vector.shape_cast %203 : vector<1x16x4xf32> to vector<16x4xf32>
    %205 = vector.shape_cast %202 : vector<16x4xf32> to vector<1x16x4xf32>
    tpu.vector_store %arg18[%c0_77, %c0_78, %c0_79], %205 {strides = array<i32>} : memref<1x16x4xf32, #tpu.memory_space<vmem>>, vector<1x16x4xf32>,
    return
  }
  func.func @transform_0(%arg0: i32, %arg1: i32, %arg2: memref<2xi32, #tpu.memory_space<smem>>) -> (i32, i32, i32) {
    %c0_i32 = arith.constant 0 : i32
    %c0_i32_0 = arith.constant 0 : i32
    return %arg1, %arg0, %c0_i32 : i32, i32, i32
  }
  func.func @transform_1(%arg0: i32, %arg1: i32, %arg2: memref<2xi32, #tpu.memory_space<smem>>) -> (i32, i32, i32, i32) {
    %c0_i32 = arith.constant 0 : i32
    %c0_i32_0 = arith.constant 0 : i32
    %c0_i32_1 = arith.constant 0 : i32
    return %arg1, %arg0, %c0_i32, %c0_i32_0 : i32, i32, i32, i32
  }
  func.func @transform_2(%arg0: i32, %arg1: i32, %arg2: memref<2xi32, #tpu.memory_space<smem>>) -> (i32, i32, i32, i32) {
    %c0_i32 = arith.constant 0 : i32
    %c0_i32_0 = arith.constant 0 : i32
    %c0_i32_1 = arith.constant 0 : i32
    return %arg1, %arg0, %c0_i32, %c0_i32_0 : i32, i32, i32, i32
  }
  func.func @transform_3(%arg0: i32, %arg1: i32, %arg2: memref<2xi32, #tpu.memory_space<smem>>) -> (i32, i32, i32) {
    %c0_i32 = arith.constant 0 : i32
    %c0_i32_0 = arith.constant 0 : i32
    %c0_i32_1 = arith.constant 0 : i32
    %c0_i32_2 = arith.constant 0 : i32
    return %c0_i32, %c0_i32_0, %c0_i32_1 : i32, i32, i32
  }
  func.func @transform_4(%arg0: i32, %arg1: i32, %arg2: memref<2xi32, #tpu.memory_space<smem>>) -> (i32, i32) {
    %c0_i32 = arith.constant 0 : i32
    %c0_i32_0 = arith.constant 0 : i32
    %c0_i32_1 = arith.constant 0 : i32
    return %c0_i32, %c0_i32_0 : i32, i32
  }
  func.func @transform_5(%arg0: i32, %arg1: i32, %arg2: memref<2xi32, #tpu.memory_space<smem>>) -> (i32, i32, i32) {
    %c0_i32 = arith.constant 0 : i32
    %c0_i32_0 = arith.constant 0 : i32
    %c0_i32_1 = arith.constant 0 : i32
    %c0_i32_2 = arith.constant 0 : i32
    return %c0_i32, %c0_i32_0, %c0_i32_1 : i32, i32, i32
  }
  func.func @transform_6(%arg0: i32, %arg1: i32, %arg2: memref<2xi32, #tpu.memory_space<smem>>) -> (i32, i32) {
    %c0_i32 = arith.constant 0 : i32
    %c0_i32_0 = arith.constant 0 : i32
    %c0_i32_1 = arith.constant 0 : i32
    return %c0_i32, %c0_i32_0 : i32, i32
  }
  func.func @transform_7(%arg0: i32, %arg1: i32, %arg2: memref<2xi32, #tpu.memory_space<smem>>) -> (i32, i32, i32) {
    %c0_i32 = arith.constant 0 : i32
    %c0_i32_0 = arith.constant 0 : i32
    %c0_i32_1 = arith.constant 0 : i32
    %c0_i32_2 = arith.constant 0 : i32
    return %c0_i32, %c0_i32_0, %c0_i32_1 : i32, i32, i32
  }
  func.func @transform_8(%arg0: i32, %arg1: i32, %arg2: memref<2xi32, #tpu.memory_space<smem>>) -> (i32, i32) {
    %c0_i32 = arith.constant 0 : i32
    %c0_i32_0 = arith.constant 0 : i32
    %c0_i32_1 = arith.constant 0 : i32
    return %c0_i32, %c0_i32_0 : i32, i32
  }
  func.func @transform_9(%arg0: i32, %arg1: i32, %arg2: memref<2xi32, #tpu.memory_space<smem>>) -> (i32, i32, i32) {
    %c0_i32 = arith.constant 0 : i32
    %c0_i32_0 = arith.constant 0 : i32
    %c0_i32_1 = arith.constant 0 : i32
    %c0_i32_2 = arith.constant 0 : i32
    return %c0_i32, %c0_i32_0, %c0_i32_1 : i32, i32, i32
  }
  func.func @transform_10(%arg0: i32, %arg1: i32, %arg2: memref<2xi32, #tpu.memory_space<smem>>) -> (i32, i32) {
    %c0_i32 = arith.constant 0 : i32
    %c0_i32_0 = arith.constant 0 : i32
    %c0_i32_1 = arith.constant 0 : i32
    return %c0_i32, %c0_i32_0 : i32, i32
  }
  func.func @transform_11(%arg0: i32, %arg1: i32, %arg2: memref<2xi32, #tpu.memory_space<smem>>) -> (i32, i32, i32) {
    %c0_i32 = arith.constant 0 : i32
    %c0_i32_0 = arith.constant 0 : i32
    %c0_i32_1 = arith.constant 0 : i32
    %c0_i32_2 = arith.constant 0 : i32
    return %c0_i32, %c0_i32_0, %c0_i32_1 : i32, i32, i32
  }
  func.func @transform_12(%arg0: i32, %arg1: i32, %arg2: memref<2xi32, #tpu.memory_space<smem>>) -> (i32, i32) {
    %c0_i32 = arith.constant 0 : i32
    %c0_i32_0 = arith.constant 0 : i32
    %c0_i32_1 = arith.constant 0 : i32
    return %c0_i32, %c0_i32_0 : i32, i32
  }
  func.func @transform_13(%arg0: i32, %arg1: i32, %arg2: memref<2xi32, #tpu.memory_space<smem>>) -> (i32, i32, i32) {
    %c0_i32 = arith.constant 0 : i32
    %c0_i32_0 = arith.constant 0 : i32
    %c0_i32_1 = arith.constant 0 : i32
    %c0_i32_2 = arith.constant 0 : i32
    return %c0_i32, %c0_i32_0, %c0_i32_1 : i32, i32, i32
  }
  func.func @transform_14(%arg0: i32, %arg1: i32, %arg2: memref<2xi32, #tpu.memory_space<smem>>) -> (i32, i32) {
    %c0_i32 = arith.constant 0 : i32
    %c0_i32_0 = arith.constant 0 : i32
    %c0_i32_1 = arith.constant 0 : i32
    return %c0_i32, %c0_i32_0 : i32, i32
  }
  func.func @transform_15(%arg0: i32, %arg1: i32, %arg2: memref<2xi32, #tpu.memory_space<smem>>) -> (i32, i32, i32) {
    %c0_i32 = arith.constant 0 : i32
    %c0_i32_0 = arith.constant 0 : i32
    return %arg1, %arg0, %c0_i32 : i32, i32, i32
  }
}

</mosaic_0001>

<bundles_post_ra>
// kernel: tpu_custom_call.1
= control target key start
LH: loop header
LB: loop body
LE: loop exit
PB: predicated region body
PF: predicated region fallthrough
CT: control target
= control target key end

     0   :  { %s3559_s0 = inlined_call_operand.vmem [shape: s32[2], index: 0, kind: input, shape index: {}]   ;;  %s3560_s1 = inlined_call_operand.vmem [shape: f32[2,48,4], index: 1, kind: input, shape index: {}]   ;;  %s3561_s2 = inlined_call_operand.vmem [shape: f32[2,3,16,4], index: 2, kind: input, shape index: {}]   ;;  %s3562_s3 = inlined_call_operand.vmem [shape: f32[2,3,16,4], index: 3, kind: input, shape index: {}]   ;;  %s3563_s4 = inlined_call_operand.vmem [shape: bf16[3,4,4], index: 4, kind: input, shape index: {}]   ;;  %s3564_s5 = inlined_call_operand.vmem [shape: f32[1,4], index: 5, kind: input, shape index: {}]   ;;  %s3565_s6 = inlined_call_operand.vmem [shape: bf16[3,4,4], index: 6, kind: input, shape index: {}]   ;;  %s3566_s7 = inlined_call_operand.vmem [shape: f32[1,4], index: 7, kind: input, shape index: {}]   ;;  %s3567_s8 = inlined_call_operand.vmem [shape: bf16[3,4,4], index: 8, kind: input, shape index: {}]   ;;  %s3568_s9 = inlined_call_operand.vmem [shape: f32[1,4], index: 9, kind: input, shape index: {}]   ;;  %s3569_s10 = inlined_call_operand.vmem [shape: bf16[3,4,4], index: 10, kind: input, shape index: {}]   ;;  %s3570_s11 = inlined_call_operand.vmem [shape: f32[1,4], index: 11, kind: input, shape index: {}]   ;;  %s3571_s12 = inlined_call_operand.vmem [shape: bf16[3,4,4], index: 12, kind: input, shape index: {}]   ;;  %s3572_s13 = inlined_call_operand.vmem [shape: f32[1,4], index: 13, kind: input, shape index: {}]   ;;  %s3573_s14 = inlined_call_operand.vmem [shape: bf16[3,4,4], index: 14, kind: input, shape index: {}]   ;;  %s3574_s15 = inlined_call_operand.vmem [shape: f32[1,4], index: 15, kind: input, shape index: {}]   ;;  %s3575_s16 = inlined_call_operand.vmem [shape: f32[2,48,4], index: 16, kind: output, shape index: {}]  }
   0x1   :  { %3580 = sst [smem:[#allocation8_spill]] %s3559_s0 }
   0x2   :  { %3581 = sst [smem:[#allocation9_spill]] %s3568_s9 }
   0x3   :  { %s3582_s23 = sld [smem:[#allocation8_spill]] }
   0x9   :  { %s21_s9 = sshll.u32 %s3582_s23, 4  ;;  %s22_s9 = int_to_ptr.vmem [resolvable:$true] %s21_s9 }
   0xa   :  { %s2888_s24 = scalar_lea.vmem %s22_s9, 16  ;;  %p2893_p1 = scmp.lt.s32.totalorder %s22_s9, %s22_s9 }
   0xb   :  { %p2889_p0 = scmp.ne.s32.totalorder %s22_s9, %s2888_s24  ;;  %p2894_p2 = scmp.lt.s32.totalorder %s2888_s24, %s2888_s24 }
   0xd   :  { %p2895_p3 = por %p2894_p2, %p2893_p1 }
   0xf   :  { %p2896_p4 = pnand %p2895_p3, %p2889_p0 }
  0x11   :  { %2899 = shalt.err (!%p2896_p4)  }
  0x12   :  { %s2942_s25 = smov [#allocation3]  }
  0x13   :  { %24 = dma.vmem_to_smem %s22_s9, 16, %s2942_s25, [#allocation2] }
  0x14   :  { %2920 = dma.done.wait [#allocation2], 16 }
  0x15   :  { %2921 = vsyncadd [#allocation2], 4294967280 }
  0x16   :  { %26 = sfence }
  0x17   :  { %s3033_s26 = smov 0   ;;  %s3035_s27 = smov 0  }
  0x18   :  { %s3037_s28 = smov 0   ;;  %s3039_s29 = smov 0  }
  0x19   :  { %s3041_s30 = smov 0  }
  0x1a LB: > { %3583 = sst [smem:[#allocation5_spill]] %s2936_s29  ;;  %s41_s9 = sadd.s32 1, %s2932_s28  ;;  %s2940_s30 = sphi %s3041_s30, %s32_s30   ;;  %s2936_s29 = sphi %s3039_s29, %s3632_s29   ;;  %s2932_s28 = sphi %s3037_s28, %s3634_s28   ;;  %s2928_s27 = sphi %s3035_s27, %s3630_s27   ;;  %s2924_s26 = sphi %s3033_s26, %s3633_s26  }
  0x1b   : > { %s44_s0 = sadd.s32 1, %s2936_s29  ;;  %p42_p5 = scmp.ge.s32.totalorder %s41_s9, 2 }
  0x1c   : > { %p2537_p6 = scmp.ge.s32.totalorder %s2940_s30, 1  ;;  %p497_p7 = scmp.lt.s32.totalorder %s2940_s30, 7 }
  0x1d   : > { %s3636_s9 = smov (%p42_p5, %s41_s9), 0  ;;  %s3638_s0 = smov (!%p42_p5, %s44_s0), %s2936_s29 }
  0x1e   : > { %3584 = sst [smem:[#allocation6_spill]] %s3636_s9  ;;  %p498_p8 = pnand %p2537_p6, %p497_p7 }
  0x1f   : > { %p46_p9 = scmp.ge.s32.totalorder %s3638_s0, 3  ;;  %s2538_s19 = sshll.u32 (!%p498_p8), %s2928_s27, 1 }
  0x20   : > { %501 = sbr.rel (%p498_p8) target bundleno = 1467 (0x5bb), region = 80  ;;  %p572_p10 = scmp.lt.s32.totalorder (!%p498_p8), %s2924_s26, 1 }
  0x21   : > { %s3640_s0 = smov (%p46_p9, %s3638_s0), 0  ;;  %p574_p11 = scmp.lt.s32.totalorder (!%p498_p8), %s2538_s19, 5 }
  0x22   : > { %3585 = sst [smem:[#allocation7_spill]] %s3640_s0  ;;  %p583_p12 = scmp.lt.s32.totalorder (!%p498_p8), %s2928_s27, 2 }
  0x23   : > { %s610_s20 = sld [smem:[#allocation3 + %s2924_s26]] (!%p498_p8)  ;;  %s2546_s24 = sshll.u32 (!%p498_p8), %s2928_s27, 4 }
  0x24   : > { %s2547_s17 = sadd.s32 (!%p498_p8), 4294967280, %s2546_s24 }
  0x25   : > { %v652_v0 = vld [vmem:[%s3563_s4] sm:$0x3]  ;;  %vm3579_vm0 = vcmask 1041408   ;;  %v618_v1 = vlaneseq  ;;  %v2943_v2 = vmov 0.0   ;;  %vm3577_vm1 = vmmov 0   ;;  %s3642_s26 = smov (!%p572_p10, %s2924_s26), 1 }
  0x26   : > { %2658 = vmatprep.subr.bf16.mxu0 %v2943_v2  ;;  %v720_v3 = vsel %vm3579_vm0, %v652_v0, 0  ;;  %2660 = vmatprep.mubr.msk.bf16.mxu0 %vm3577_vm1, %v2943_v2  ;;  %v653_v5 = vld [vmem:[%s3563_s4 + $0x2] sm:$0x3]  ;;  %s3644_s19 = smov (!%p574_p11, %s2538_s19), 5  ;;  %s2844_s23 = smul.u32 6, %s3642_s26  ;;  %v626_v12 = vstv %s2547_s17 }
  0x27   : > { %2659 = vmatpush3.bf16.msra.mxu0 %v720_v3  ;;  %v619_v4 = vshrl.u32 %v618_v1, 7  ;;  %2672 = vmatprep.subr.bf16.mxu1 %v2943_v2  ;;  %v828_v6 = vsel %vm3579_vm0, %v653_v5, 0  ;;  %s3646_s27 = smov (!%p583_p12, %s2928_s27), 2  ;;  %v654_v37 = vld [vmem:[%s3563_s4 + $0x4] sm:$0x3] }
  0x28   : > { %2686 = vmatprep.subr.bf16.mxu0 %v2943_v2  ;;  %2674 = vmatprep.mubr.msk.bf16.mxu1 %vm3577_vm1, %v2943_v2  ;;  %s3092_s25 = sadd.s32 %s2844_s23, %s3644_s19  ;;  %s2540_s21 = sshll.u32 %s3646_s27, 1 }
  0x29   : > { %v620_v7 = vadd.s32 8, %v619_v4  ;;  %v621_v8 = vadd.s32 16, %v619_v4  ;;  %v622_v9 = vadd.s32 24, %v619_v4  ;;  %2673 = vmatpush3.bf16.msra.mxu1 %v828_v6  ;;  %v623_v10 = vadd.s32 32, %v619_v4  ;;  %s2539_s18 = sshll.u32 %s3092_s25, 3  ;;  %s587_s9 = sadd.s32 %s2844_s23, %s2540_s21 }
  0x2a   : > { %v624_v11 = vadd.s32 40, %v619_v4  ;;  %2700 = vmatprep.subr.bf16.mxu1 %v2943_v2  ;;  %v639_v13 = vstv %s610_s20  ;;  %s579_s0 = scalar_lea.vmem %s3560_s1, %s2539_s18  ;;  %v627_v14 = vadd.s32 %v626_v12, %v619_v4  ;;  %s2541_s29 = sshll.u32 %s587_s9, 3 }
  0x2b   : > { %v628_v15 = vadd.s32 %v626_v12, %v620_v7  ;;  %v629_v16 = vadd.s32 %v626_v12, %v621_v8  ;;  %v630_v17 = vadd.s32 %v626_v12, %v622_v9  ;;  %v3100_v18 = vld [vmem:[%s579_s0] sm:$0xff]  ;;  %v3102_v19 = vld [vmem:[%s579_s0 + $0x8] sm:$0xff]  ;;  %v631_v20 = vadd.s32 %v626_v12, %v623_v10  ;;  %s589_s20 = scalar_lea.vmem %s3561_s2, %s2541_s29  ;;  %s598_s17 = scalar_lea.vmem %s3562_s3, %s2541_s29 }
  0x2c   : > { %v632_v21 = vadd.s32 %v626_v12, %v624_v11  ;;  %vm633_vm2 = vcmp.ge.s32.totalorder %v627_v14, 0  ;;  %v3110_v22 = vld [vmem:[%s589_s20] sm:$0xff]  ;;  %v3112_v23 = vld [vmem:[%s589_s20 + $0x8] sm:$0xff]  ;;  %vm640_vm6 = vcmp.lt.s32.totalorder %v627_v14, %v639_v13  ;;  %vm662_vm14 = vcmp.ge.f32.partialorder %v3100_v18, 0.0  ;;  %s3611_s29 = sld [smem:[#allocation9_spill]] }
  0x2d   : > { %vm634_vm3 = vcmp.ge.s32.totalorder %v628_v15, 0  ;;  %vm635_vm4 = vcmp.ge.s32.totalorder %v629_v16, 0  ;;  %vm636_vm5 = vcmp.ge.s32.totalorder %v630_v17, 0  ;;  %vm641_vm7 = vcmp.lt.s32.totalorder %v628_v15, %v639_v13  ;;  %vm3114_vm11 = vmand %vm633_vm2, %vm640_vm6  ;;  %v3122_v25 = vld [vmem:[%s598_s17] sm:$0xff]  ;;  %v3138_v32 = vld [vmem:[%s598_s17 + $0x8] sm:$0xff]  ;;  %s607_s17 = scalar_lea.vmem %s3575_s16, %s2539_s18 }
  0x2e   : > { %vm642_vm8 = vcmp.lt.s32.totalorder %v629_v16, %v639_v13  ;;  %vm643_vm9 = vcmp.lt.s32.totalorder %v630_v17, %v639_v13  ;;  %vm660_vm12 = vcmp.ge.f32.partialorder %v3110_v22, 0.0  ;;  %vm661_vm13 = vcmp.ge.f32.partialorder %v3112_v23, 0.0  ;;  %vm3125_vm1 = vmand %vm634_vm3, %vm641_vm7 }
  0x2f   : > { %vm663_vm15 = vcmp.ge.f32.partialorder %v3102_v19, 0.0  ;;  %v666_v27 = vmul.f32 0.1, %v3110_v22  ;;  %v667_v28 = vmul.f32 0.1, %v3112_v23  ;;  %vm644_vm2 = vcmp.lt.s32.totalorder %v631_v20, %v639_v13  ;;  %vm3133_vm6 = vmand %vm635_vm4, %vm642_vm8 }
  0x30   : > { %v668_v29 = vmul.f32 0.1, %v3100_v18  ;;  %v669_v31 = vmul.f32 0.1, %v3102_v19  ;;  %vm637_vm3 = vcmp.ge.s32.totalorder %v631_v20, 0  ;;  %vm638_vm7 = vcmp.ge.s32.totalorder %v632_v21, 0  ;;  %vm3142_vm0 = vmand %vm636_vm5, %vm643_vm9 }
  0x31   : > { %vm645_vm10 = vcmp.lt.s32.totalorder %v632_v21, %v639_v13  ;;  %v672_v34 = vsel %vm660_vm12, %v3110_v22, %v666_v27  ;;  %v673_v35 = vsel %vm661_vm13, %v3112_v23, %v667_v28  ;;  %vm664_vm4 = vcmp.ge.f32.partialorder %v3122_v25, 0.0  ;;  %vm3172_vm5 = vmand %vm637_vm3, %vm644_vm2  ;;  %v656_v21 = vld [vmem:[%s3565_s6] sm:$0x3]  ;;  %v657_v28 = vld [vmem:[%s3565_s6 + $0x2] sm:$0x3] }
  0x32   : > { %v674_v36 = vsel %vm662_vm14, %v3100_v18, %v668_v29  ;;  %v675_v38 = vsel %vm663_vm15, %v3102_v19, %v669_v31  ;;  %v690_v39 = vsel %vm3114_vm11, %v672_v34, 0.0  ;;  %v691_v40 = vsel %vm3125_vm1, %v673_v35, 0.0  ;;  %vm3181_vm13 = vmand %vm638_vm7, %vm645_vm10 }
  0x33   : > { %v692_v41 = vsel %vm3133_vm6, %v674_v36, 0.0  ;;  %v693_v42 = vsel %vm3142_vm0, %v675_v38, 0.0  ;;  %v696_v43 = vpack.c.bf16 %v691_v40, %v690_v39  ;;  %vm665_vm8 = vcmp.ge.f32.partialorder %v3138_v32, 0.0 }
  0x34   : > { %v670_v45 = vmul.f32 0.1, %v3122_v25  ;;  %v697_v46 = vpack.c.bf16 %v693_v42, %v692_v41  ;;  %vm708_vm9 = vcmask 31744   ;;  %vm3596_vm12 = vcmask 1041408  }
  0x35   : > { %v909_v47 = vsel %vm3596_vm12, %v654_v37, 0  ;;  %v671_v49 = vmul.f32 0.1, %v3138_v32  ;;  %v703_v50 = vrot.slane %v696_v43, 1  ;;  %v793_v51 = vshrl.u32 %v696_v43, 16  ;;  %vm3602_vm7 = vmmov %vm3596_vm12 }
  0x36   : > { %v796_v52 = vshll.u32 %v696_v43, 16  ;;  %v676_v53 = vsel %vm664_vm4, %v3122_v25, %v670_v45  ;;  %v704_v54 = vrot.slane %v697_v46, 1  ;;  %v801_v55 = vshrl.u32 %v697_v46, 16  ;;  %vm3603_vm4 = vmmov %vm3602_vm7 }
  0x37   : > { %v804_v56 = vshll.u32 %v697_v46, 16  ;;  %v677_v57 = vsel %vm665_vm8, %v3138_v32, %v671_v49  ;;  %v795_v58 = vrot.slane %v793_v51, 1  ;;  %v694_v60 = vsel %vm3172_vm5, %v676_v53, 0.0  ;;  %v2551_v51 = vld [vmem:[%s3564_s5] ss:$0 sm:$0xff] }
  0x38   : > { %v798_v59 = vrot.slane %v796_v52, 2  ;;  %v695_v61 = vsel %vm3181_vm13, %v677_v57, 0.0  ;;  %vm3599_vm10 = vcmask 1046528   ;;  %v803_v63 = vrot.slane %v801_v55, 1 }
  0x39   : > { %v705_v62 = vsel %vm3599_vm10, %v703_v50, %v704_v54  ;;  %v806_v0 = vrot.slane %v804_v56, 2  ;;  %v698_v1 = vpack.c.bf16 %v695_v61, %v694_v60  ;;  %vm791_vm14 = vsmask.f32 6400  ;;  %vm3601_vm2 = vmmov %vm3599_vm10 }
  0x3a   : > { %2661 = vmatmul.mubr.msk.bf16.vlgmr.msra.gmra.mxu0 %vm708_vm9, %v705_v62  ;;  %v799_v3 = vor.u32 %v798_v59, %v795_v58  ;;  %vm3600_vm15 = vmmov 0   ;;  %v894_v14 = vrot.slane %v696_v43, 2  ;;  %v895_v15 = vrot.slane %v697_v46, 2 }
  0x3b   : > { %2687 = vmatpush3.bf16.msra.mxu0 %v909_v47  ;;  %v807_v4 = vor.u32 %v806_v0, %v803_v63  ;;  %2664 = vmatprep.mubr.msk.bf16.mxu0 %vm3600_vm15, %v2943_v2  ;;  %v706_v5 = vrot.slane %v698_v1, 1  ;;  %v810_v6 = vshrl.u32 %v698_v1, 16  ;;  %v813_v7 = vshll.u32 %v698_v1, 16 }
  0x3c   : > { %2714 = vmatprep.subr.bf16.mxu0 %v2943_v2  ;;  %vm893_vm3 = vcmask 1045504   ;;  %v897_v17 = vrot.slane %v698_v1, 2  ;;  %v1061_v27 = vsel %vm3602_vm7, %v656_v21, 0  ;;  %v1148_v29 = vsel %vm3603_vm4, %v657_v28, 0 }
  0x3d   : > { %v808_v8 = vsel %vm791_vm14, %v799_v3, %v807_v4  ;;  %v812_v9 = vrot.slane %v810_v6, 1  ;;  %v815_v10 = vrot.slane %v813_v7, 2  ;;  %v707_v11 = vsel %vm3601_vm2, %v704_v54, %v706_v5 }
  0x3e   : > { %2675 = vmatmul.mubr.msk.bf16.vlgmr.msra.gmra.mxu1 %vm708_vm9, %v808_v8  ;;  %v896_v16 = vsel %vm893_vm3, %v894_v14, %v895_v15  ;;  %v898_v20 = vsel %vm893_vm3, %v895_v15, %v897_v17  ;;  %vm998_vm10 = vcmask 1042432  }
  0x3f   : > { %2678 = vmatprep.mubr.msk.bf16.mxu1 %vm3600_vm15, %v2943_v2  ;;  %v816_v12 = vor.u32 %v815_v10, %v812_v9  ;;  %2701 = vmatpush3.bf16.msra.mxu1 %v1061_v27 }
  0x40   : > { %2728 = vmatprep.subr.bf16.mxu1 %v2943_v2 }
  0x41   : > { %v817_v13 = vsel %vm791_vm14, %v807_v4, %v816_v12 }
  0x42   : > { %2665 = vmatmul.mubr.msk.bf16.gmra.mxu0 %vm708_vm9, %v707_v11 }
  0x43   : > { %2668 = vmatprep.mubr.msk.bf16.mxu0 %vm3600_vm15, %v2943_v2 }
  0x46   : > { %2679 = vmatmul.mubr.msk.bf16.gmra.mxu1 %vm708_vm9, %v817_v13 }
  0x47   : > { %2682 = vmatprep.mubr.msk.bf16.mxu1 %vm3600_vm15, %v2943_v2 }
  0x4a   : > { %2669 = vmatmul.mubr.msk.bf16.gmra.mxu0 %vm708_vm9, %v706_v5 }
  0x4b   : > { %2688 = vmatprep.mubr.msk.bf16.mxu0 %vm3600_vm15, %v2943_v2 }
  0x4e   : > { %2683 = vmatmul.mubr.msk.bf16.gmra.mxu1 %vm708_vm9, %v816_v12 }
  0x4f   : > { %2702 = vmatprep.mubr.msk.bf16.mxu1 %vm3600_vm15, %v2943_v2 }
  0x52   : > { %2689 = vmatmul.mubr.msk.bf16.vlgmr.msra.gmra.mxu0 %vm708_vm9, %v896_v16 }
  0x53   : > { %2692 = vmatprep.mubr.msk.bf16.mxu0 %vm3600_vm15, %v2943_v2  ;;  %2715 = vmatpush3.bf16.msra.mxu0 %v1148_v29 }
  0x54   : > { %2742 = vmatprep.subr.bf16.mxu0 %v2943_v2 }
  0x5a   : > { %2693 = vmatmul.mubr.msk.bf16.gmra.mxu0 %vm708_vm9, %v898_v20 }
  0x5b   : > { %2696 = vmatprep.mubr.msk.bf16.mxu0 %vm3600_vm15, %v2943_v2 }
  0x62   : > { %2697 = vmatmul.mubr.msk.bf16.gmra.mxu0 %vm708_vm9, %v897_v17 }
  0x63   : > { %2716 = vmatprep.mubr.msk.bf16.mxu0 %vm3600_vm15, %v2943_v2 }
  0xfa   : > { %v756_v31 = vpop.f32.mrf.mxu0 }
  0xfb   : > { %v785_v56 = vadd.f32 %v2551_v51, %v756_v31 }
  0xfc   : > { %v2662_v34 = vpop.f32.mrf.mxu0 }
  0xfe   : > { %v759_v35 = vpop.f32.mrf.mxu0  ;;  %v864_v36 = vpop.f32.mrf.mxu1 }
  0xff   : > { %v887_v59 = vadd.f32 %v864_v36, %v785_v56  ;;  %v786_v62 = vadd.f32 %v2551_v51, %v759_v35 }
 0x100   : > { %v2663_v37 = vpop.f32.mrf.mxu0  ;;  %v2676_v38 = vpop.f32.mrf.mxu1 }
 0x102   : > { %v764_v39 = vpop.f32.mrf.mxu0  ;;  %v867_v40 = vpop.f32.mrf.mxu1 }
 0x103   : > { %v888_v3 = vadd.f32 %v867_v40, %v786_v62  ;;  %v787_v6 = vadd.f32 %v2551_v51, %v764_v39 }
 0x104   : > { %v2666_v41 = vpop.f32.mrf.mxu0  ;;  %v2677_v42 = vpop.f32.mrf.mxu1 }
 0x106   : > { %v767_v43 = vpop.f32.mrf.mxu0  ;;  %v872_v45 = vpop.f32.mrf.mxu1 }
 0x107   : > { %v889_v9 = vadd.f32 %v872_v45, %v787_v6  ;;  %v788_v13 = vadd.f32 %v2551_v51, %v767_v43 }
 0x108   : > { %v2667_v46 = vpop.f32.mrf.mxu0  ;;  %v2680_v47 = vpop.f32.mrf.mxu1 }
 0x10a   : > { %v772_v49 = vpop.f32.mrf.mxu0  ;;  %v875_v50 = vpop.f32.mrf.mxu1 }
 0x10b   : > { %v890_v21 = vadd.f32 %v875_v50, %v788_v13  ;;  %v789_v31 = vadd.f32 %v2551_v51, %v772_v49 }
 0x10c   : > { %v2670_v52 = vpop.f32.mrf.mxu0  ;;  %v2681_v53 = vpop.f32.mrf.mxu1 }
 0x10e   : > { %v775_v54 = vpop.f32.mrf.mxu0  ;;  %v880_v55 = vpop.f32.mrf.mxu1 }
 0x10f   : > { %v891_v40 = vadd.f32 %v880_v55, %v789_v31  ;;  %v790_v45 = vadd.f32 %v2551_v51, %v775_v54 }
 0x110   : > { %v2671_v57 = vpop.f32.mrf.mxu0  ;;  %v2684_v58 = vpop.f32.mrf.mxu1 }
 0x112   : > { %v883_v60 = vpop.f32.mrf.mxu1  ;;  %v945_v61 = vpop.f32.mrf.mxu0 }
 0x113   : > { %v968_v63 = vadd.f32 %v945_v61, %v887_v59  ;;  %v892_v53 = vadd.f32 %v883_v60, %v790_v45 }
 0x114   : > { %v2690_v0 = vpop.f32.mrf.mxu0  ;;  %v2685_v1 = vpop.f32.mrf.mxu1 }
 0x115   : > { %v980_v4 = vmul.f32 0.1, %v968_v63  ;;  %vm974_vm8 = vcmp.ge.f32.partialorder %v968_v63, 0.0 }
 0x116   : > { %v948_v5 = vpop.f32.mrf.mxu0 }
 0x117   : > { %v969_v7 = vadd.f32 %v948_v5, %v888_v3  ;;  %v986_v10 = vsel %vm974_vm8, %v968_v63, %v980_v4 }
 0x118   : > { %v2691_v8 = vpop.f32.mrf.mxu0  ;;  %v999_v16 = vrot.slane %v986_v10, 5 }
 0x119   : > { %vm975_vm12 = vcmp.ge.f32.partialorder %v969_v7, 0.0  ;;  %v981_v11 = vmul.f32 0.1, %v969_v7 }
 0x11a   : > { %v953_v12 = vpop.f32.mrf.mxu0  ;;  %v1016_v37 = vsel %vm3114_vm11, %v999_v16, 0.0 }
 0x11b   : > { %v987_v14 = vsel %vm975_vm12, %v969_v7, %v981_v11  ;;  %v970_v15 = vadd.f32 %v953_v12, %v889_v9  ;;  %vm3604_vm12 = vcmask 1041408  }
 0x11c   : > { %v1000_v17 = vrot.slane %v987_v14, 5  ;;  %v2694_v20 = vpop.f32.mrf.mxu0 }
 0x11d   : > { %vm976_vm2 = vcmp.ge.f32.partialorder %v970_v15, 0.0  ;;  %v982_v27 = vmul.f32 0.1, %v970_v15 }
 0x11e   : > { %v1001_v28 = vsel %vm998_vm10, %v999_v16, %v1000_v17  ;;  %v956_v29 = vpop.f32.mrf.mxu0 }
 0x11f   : > { %v1017_v34 = vsel %vm3125_vm1, %v1001_v28, 0.0  ;;  %v988_v35 = vsel %vm976_vm2, %v970_v15, %v982_v27  ;;  %v971_v36 = vadd.f32 %v956_v29, %v890_v21  ;;  %v658_v15 = vld [vmem:[%s3565_s6 + $0x4] sm:$0x3]  ;;  %vm3605_vm2 = vmmov %vm3604_vm12 }
 0x120   : > { %v1002_v38 = vrot.slane %v988_v35, 5  ;;  %v2695_v39 = vpop.f32.mrf.mxu0  ;;  %v3246_v41 = vpack.c.bf16 %v1017_v34, %v1016_v37  ;;  %v1233_v28 = vsel %vm3604_vm12, %v658_v15, 0 }
 0x121   : > { %vm977_vm7 = vcmp.ge.f32.partialorder %v971_v36, 0.0  ;;  %v983_v42 = vmul.f32 0.1, %v971_v36 }
 0x122   : > { %v961_v43 = vpop.f32.mrf.mxu0  ;;  %v1003_v49 = vsel %vm998_vm10, %v1000_v17, %v1002_v38  ;;  %v1026_v56 = vshrl.u32 %v3246_v41, 16  ;;  %v1029_v58 = vshll.u32 %v3246_v41, 16  ;;  %v1133_v3 = vrot.slane %v3246_v41, 2 }
 0x123   : > { %v989_v46 = vsel %vm977_vm7, %v971_v36, %v983_v42  ;;  %v972_v47 = vadd.f32 %v961_v43, %v891_v40  ;;  %v1018_v61 = vsel %vm3133_vm6, %v1003_v49, 0.0  ;;  %vm3606_vm7 = vmmov %vm3605_vm2 }
 0x124   : > { %v1004_v50 = vrot.slane %v989_v46, 5  ;;  %v2698_v52 = vpop.f32.mrf.mxu0  ;;  %v1028_v4 = vrot.slane %v1026_v56, 1  ;;  %v1031_v8 = vrot.slane %v1029_v58, 2  ;;  %v1212_v45 = vrot.slane %v1026_v56, 2  ;;  %v1324_v56 = vld [vmem:[%s3567_s8] sm:$0x3] }
 0x125   : > { %vm978_vm4 = vcmp.ge.f32.partialorder %v972_v47, 0.0  ;;  %v984_v57 = vmul.f32 0.1, %v972_v47  ;;  %v1213_v46 = vrot.slane %v1029_v58, 3  ;;  %v1394_v58 = vsel %vm3605_vm2, %v1324_v56, 0 }
 0x126   : > { %v1005_v55 = vsel %vm998_vm10, %v1002_v38, %v1004_v50  ;;  %v964_v59 = vpop.f32.mrf.mxu0  ;;  %v1032_v17 = vor.u32 %v1031_v8, %v1028_v4  ;;  %v1310_v56 = vrot.slane %v3122_v25, 4  ;;  %v1312_v25 = vrot.slane %v3138_v32, 4 }
 0x127   : > { %v1019_v51 = vsel %vm3142_vm0, %v1005_v55, 0.0  ;;  %v990_v54 = vsel %vm978_vm4, %v972_v47, %v984_v57  ;;  %v973_v62 = vadd.f32 %v964_v59, %v892_v53  ;;  %v1214_v49 = vor.u32 %v1213_v46, %v1212_v45  ;;  %v1325_v59 = vld [vmem:[%s3567_s8 + $0x2] sm:$0x3] }
 0x128   : > { %v1023_v63 = vpack.c.bf16 %v1019_v51, %v1018_v61  ;;  %v1006_v0 = vrot.slane %v990_v54, 5  ;;  %v2699_v60 = vpop.f32.mrf.mxu0  ;;  %v1500_v61 = vsel %vm3606_vm7, %v1325_v59, 0  ;;  %vm1302_vm4 = vcmask 1043456  }
 0x129   : > { %vm979_vm8 = vcmp.ge.f32.partialorder %v973_v62, 0.0  ;;  %v985_v1 = vmul.f32 0.1, %v973_v62 }
 0x12a   : > { %v1034_v5 = vshrl.u32 %v1023_v63, 16  ;;  %v1037_v6 = vshll.u32 %v1023_v63, 16  ;;  %v1134_v7 = vrot.slane %v1023_v63, 2  ;;  %v1007_v9 = vsel %vm998_vm10, %v1004_v50, %v1006_v0 }
 0x12b   : > { %v991_v10 = vsel %vm979_vm8, %v973_v62, %v985_v1  ;;  %v1020_v21 = vsel %vm3172_vm5, %v1007_v9, 0.0 }
 0x12c   : > { %v1008_v11 = vrot.slane %v991_v10, 5  ;;  %v1135_v12 = vsel %vm893_vm3, %v1133_v3, %v1134_v7  ;;  %v1036_v13 = vrot.slane %v1034_v5, 1  ;;  %v1039_v14 = vrot.slane %v1037_v6, 2 }
 0x12d   : > { %2717 = vmatmul.mubr.msk.bf16.vlgmr.msra.gmra.mxu0 %vm708_vm9, %v1135_v12  ;;  %v1215_v42 = vrot.slane %v1034_v5, 2  ;;  %v1216_v43 = vrot.slane %v1037_v6, 3 }
 0x12e   : > { %v1009_v16 = vsel %vm998_vm10, %v1006_v0, %v1008_v11  ;;  %v1040_v20 = vor.u32 %v1039_v14, %v1036_v13  ;;  %2720 = vmatprep.mubr.msk.bf16.mxu0 %vm3600_vm15, %v2943_v2  ;;  %2743 = vmatpush3.bf16.msra.mxu0 %v1394_v58  ;;  %v2561_v14 = vld [vmem:[%s3566_s7] ss:$0 sm:$0xff] }
 0x12f   : > { %v1021_v27 = vsel %vm3181_vm13, %v1009_v16, 0.0  ;;  %v1217_v47 = vor.u32 %v1216_v43, %v1215_v42  ;;  %2770 = vmatprep.subr.bf16.mxu0 %v2943_v2 }
 0x130   : > { %v1024_v29 = vpack.c.bf16 %v1021_v27, %v1020_v21  ;;  %v1041_v31 = vsel %vm791_vm14, %v1032_v17, %v1040_v20 }
 0x131   : > { %2703 = vmatmul.mubr.msk.bf16.vlgmr.msra.gmra.mxu1 %vm708_vm9, %v1041_v31 }
 0x132   : > { %2729 = vmatpush3.bf16.msra.mxu1 %v1233_v28  ;;  %v1136_v34 = vrot.slane %v1024_v29, 2  ;;  %2706 = vmatprep.mubr.msk.bf16.mxu1 %vm3600_vm15, %v2943_v2  ;;  %v1043_v35 = vshrl.u32 %v1024_v29, 16  ;;  %v1046_v36 = vshll.u32 %v1024_v29, 16  ;;  %v1303_v28 = vrot.slane %v3110_v22, 4 }
 0x133   : > { %2756 = vmatprep.subr.bf16.mxu1 %v2943_v2  ;;  %v1304_v29 = vrot.slane %v3112_v23, 4  ;;  %v1308_v22 = vrot.slane %v3102_v19, 4 }
 0x134   : > { %v1137_v37 = vsel %vm893_vm3, %v1134_v7, %v1136_v34  ;;  %v1045_v38 = vrot.slane %v1043_v35, 1  ;;  %v1048_v39 = vrot.slane %v1046_v36, 2  ;;  %v1219_v52 = vrot.slane %v1043_v35, 2 }
 0x135   : > { %2721 = vmatmul.mubr.msk.bf16.gmra.mxu0 %vm708_vm9, %v1137_v37  ;;  %v1220_v53 = vrot.slane %v1046_v36, 3  ;;  %v1305_v37 = vsel %vm1302_vm4, %v1303_v28, %v1304_v29 }
 0x136   : > { %v1049_v40 = vor.u32 %v1048_v39, %v1045_v38  ;;  %2724 = vmatprep.mubr.msk.bf16.mxu0 %vm3600_vm15, %v2943_v2  ;;  %v1306_v38 = vrot.slane %v3100_v18, 4 }
 0x137   : > { %v1221_v57 = vor.u32 %v1220_v53, %v1219_v52 }
 0x138   : > { %v1050_v41 = vsel %vm791_vm14, %v1040_v20, %v1049_v40  ;;  %vm1211_vm14 = vsmask.f32 5376  ;;  %v1307_v46 = vsel %vm1302_vm4, %v1304_v29, %v1306_v38  ;;  %v1309_v18 = vsel %vm1302_vm4, %v1306_v38, %v1308_v22 }
 0x139   : > { %2707 = vmatmul.mubr.msk.bf16.gmra.mxu1 %vm708_vm9, %v1050_v41  ;;  %v1218_v50 = vsel %vm1211_vm14, %v1214_v49, %v1217_v47  ;;  %v1222_v55 = vsel %vm1211_vm14, %v1217_v47, %v1221_v57 }
 0x13a   : > { %2710 = vmatprep.mubr.msk.bf16.mxu1 %vm3600_vm15, %v2943_v2 }
 0x13d   : > { %2725 = vmatmul.mubr.msk.bf16.gmra.mxu0 %vm708_vm9, %v1136_v34 }
 0x13e   : > { %2744 = vmatprep.mubr.msk.bf16.mxu0 %vm3600_vm15, %v2943_v2 }
 0x141   : > { %2711 = vmatmul.mubr.msk.bf16.gmra.mxu1 %vm708_vm9, %v1049_v40 }
 0x142   : > { %2730 = vmatprep.mubr.msk.bf16.mxu1 %vm3600_vm15, %v2943_v2 }
 0x149   : > { %2731 = vmatmul.mubr.msk.bf16.vlgmr.msra.gmra.mxu1 %vm708_vm9, %v1218_v50 }
 0x14a   : > { %2734 = vmatprep.mubr.msk.bf16.mxu1 %vm3600_vm15, %v2943_v2  ;;  %2757 = vmatpush3.bf16.msra.mxu1 %v1500_v61 }
 0x151   : > { %2735 = vmatmul.mubr.msk.bf16.gmra.mxu1 %vm708_vm9, %v1222_v55 }
 0x152   : > { %2738 = vmatprep.mubr.msk.bf16.mxu1 %vm3600_vm15, %v2943_v2 }
 0x159   : > { %2739 = vmatmul.mubr.msk.bf16.gmra.mxu1 %vm708_vm9, %v1221_v57 }
 0x15a   : > { %2758 = vmatprep.mubr.msk.bf16.mxu1 %vm3600_vm15, %v2943_v2 }
 0x1ed   : > { %v1184_v51 = vpop.f32.mrf.mxu0 }
 0x1ef   : > { %v2718_v54 = vpop.f32.mrf.mxu0 }
 0x1f1   : > { %v1097_v62 = vpop.f32.mrf.mxu1  ;;  %v1187_v63 = vpop.f32.mrf.mxu0 }
 0x1f2   : > { %v1125_v21 = vadd.f32 %v2561_v14, %v1097_v62 }
 0x1f3   : > { %v2704_v0 = vpop.f32.mrf.mxu1  ;;  %v2719_v60 = vpop.f32.mrf.mxu0 }
 0x1f4   : > { %v1206_v35 = vadd.f32 %v1184_v51, %v1125_v21  ;;  %v1313_v21 = vsel %vm1302_vm4, %v1310_v56, %v1312_v25 }
 0x1f5   : > { %v1100_v1 = vpop.f32.mrf.mxu1  ;;  %v1192_v3 = vpop.f32.mrf.mxu0 }
 0x1f6   : > { %v1126_v34 = vadd.f32 %v2561_v14, %v1100_v1 }
 0x1f7   : > { %v2705_v4 = vpop.f32.mrf.mxu1  ;;  %v2722_v5 = vpop.f32.mrf.mxu0 }
 0x1f8   : > { %v1207_v43 = vadd.f32 %v1187_v63, %v1126_v34  ;;  %v1311_v5 = vsel %vm1302_vm4, %v1308_v22, %v1310_v56 }
 0x1f9   : > { %v1105_v6 = vpop.f32.mrf.mxu1  ;;  %v1195_v7 = vpop.f32.mrf.mxu0 }
 0x1fa   : > { %v1127_v41 = vadd.f32 %v2561_v14, %v1105_v6 }
 0x1fb   : > { %v2708_v8 = vpop.f32.mrf.mxu1  ;;  %v2723_v9 = vpop.f32.mrf.mxu0 }
 0x1fc   : > { %v1208_v53 = vadd.f32 %v1192_v3, %v1127_v41 }
 0x1fd   : > { %v1108_v10 = vpop.f32.mrf.mxu1  ;;  %v1200_v11 = vpop.f32.mrf.mxu0 }
 0x1fe   : > { %v1128_v50 = vadd.f32 %v2561_v14, %v1108_v10 }
 0x1ff   : > { %v2709_v12 = vpop.f32.mrf.mxu1  ;;  %v2726_v13 = vpop.f32.mrf.mxu0 }
 0x200   : > { %v1209_v0 = vadd.f32 %v1195_v7, %v1128_v50 }
 0x201   : > { %v1113_v15 = vpop.f32.mrf.mxu1  ;;  %v1203_v16 = vpop.f32.mrf.mxu0 }
 0x202   : > { %v1129_v54 = vadd.f32 %v2561_v14, %v1113_v15 }
 0x203   : > { %v2712_v17 = vpop.f32.mrf.mxu1  ;;  %v2727_v20 = vpop.f32.mrf.mxu0 }
 0x204   : > { %v1210_v13 = vadd.f32 %v1200_v11, %v1129_v54 }
 0x205   : > { %v1116_v27 = vpop.f32.mrf.mxu1 }
 0x207   : > { %v2713_v31 = vpop.f32.mrf.mxu1 }
 0x209   : > { %v1269_v36 = vpop.f32.mrf.mxu1 }
 0x20a   : > { %v1291_v39 = vadd.f32 %v1269_v36, %v1206_v35 }
 0x20b   : > { %v2732_v40 = vpop.f32.mrf.mxu1 }
 0x20c   : > { %v1319_v42 = vadd.f32 %v1305_v37, %v1291_v39 }
 0x20d   : > { %v1272_v45 = vpop.f32.mrf.mxu1 }
 0x20e   : > { %vm1332_vm8 = vcmp.ge.f32.partialorder %v1319_v42, 0.0  ;;  %v1337_v23 = vmul.f32 0.1, %v1319_v42  ;;  %v1292_v47 = vadd.f32 %v1272_v45, %v1207_v43  ;;  %v1931_v58 = vrot.slane %v1319_v42, 4  ;;  %v1326_v45 = vld [vmem:[%s3567_s8 + $0x4] sm:$0x3] }
 0x20f   : > { %v2733_v49 = vpop.f32.mrf.mxu1 }
 0x210   : > { %v1320_v52 = vadd.f32 %v1307_v46, %v1292_v47  ;;  %v1342_v57 = vsel %vm1332_vm8, %v1319_v42, %v1337_v23  ;;  %vm3607_vm8 = vcmask 1041408  }
 0x211   : > { %v1277_v55 = vpop.f32.mrf.mxu1  ;;  %v1352_v1 = vrot.slane %v1342_v57, 4 }
 0x212   : > { %vm1333_vm12 = vcmp.ge.f32.partialorder %v1320_v52, 0.0  ;;  %v1338_v59 = vmul.f32 0.1, %v1320_v52  ;;  %v1293_v61 = vadd.f32 %v1277_v55, %v1208_v53  ;;  %v1932_v51 = vrot.slane %v1320_v52, 4 }
 0x213   : > { %v2736_v19 = vpop.f32.mrf.mxu1  ;;  %v1367_v17 = vsel %vm3114_vm11, %v1352_v1, 0.0  ;;  %v1579_v55 = vsel %vm3607_vm8, %v1326_v45, 0 }
 0x214   : > { %v1343_v62 = vsel %vm1333_vm12, %v1320_v52, %v1338_v59  ;;  %v1321_v63 = vadd.f32 %v1309_v18, %v1293_v61  ;;  %v3320_v60 = vsel %vm1302_vm4, %v1931_v58, %v1932_v51  ;;  %vm1463_vm12 = vsmask.f32 4352 }
 0x215   : > { %v1353_v3 = vrot.slane %v1343_v62, 4  ;;  %v1280_v4 = vpop.f32.mrf.mxu1 }
 0x216   : > { %vm1334_vm14 = vcmp.ge.f32.partialorder %v1321_v63, 0.0  ;;  %v1339_v6 = vmul.f32 0.1, %v1321_v63  ;;  %v1294_v8 = vadd.f32 %v1280_v4, %v1209_v0  ;;  %v1934_v9 = vrot.slane %v1321_v63, 4 }
 0x217   : > { %v1354_v10 = vsel %vm1302_vm4, %v1352_v1, %v1353_v3  ;;  %v2737_v12 = vpop.f32.mrf.mxu1 }
 0x218   : > { %v1368_v7 = vsel %vm3125_vm1, %v1354_v10, 0.0  ;;  %v1344_v14 = vsel %vm1334_vm14, %v1321_v63, %v1339_v6  ;;  %v1322_v15 = vadd.f32 %v1311_v5, %v1294_v8  ;;  %v3328_v16 = vsel %vm1302_vm4, %v1932_v51, %v1934_v9 }
 0x219   : > { %v1355_v32 = vrot.slane %v1344_v14, 4  ;;  %v1285_v20 = vpop.f32.mrf.mxu1  ;;  %v3333_v11 = vpack.c.bf16 %v1368_v7, %v1367_v17 }
 0x21a   : > { %vm1335_vm2 = vcmp.ge.f32.partialorder %v1322_v15, 0.0  ;;  %v1340_v27 = vmul.f32 0.1, %v1322_v15  ;;  %v1295_v28 = vadd.f32 %v1285_v20, %v1210_v13  ;;  %v1936_v29 = vrot.slane %v1322_v15, 4 }
 0x21b   : > { %v2740_v31 = vpop.f32.mrf.mxu1  ;;  %v1356_v36 = vsel %vm1302_vm4, %v1353_v3, %v1355_v32  ;;  %v1465_v46 = vshrl.u32 %v3333_v11, 16  ;;  %v1468_v22 = vshll.u32 %v3333_v11, 16  ;;  %v1379_v57 = vrot.slane %v3333_v11, 2 }
 0x21c   : > { %v1345_v34 = vsel %vm1335_vm2, %v1322_v15, %v1340_v27  ;;  %v1323_v35 = vadd.f32 %v1313_v21, %v1295_v28  ;;  %v3337_v39 = vsel %vm1302_vm4, %v1934_v9, %v1936_v29  ;;  %v1369_v23 = vsel %vm3133_vm6, %v1356_v36, 0.0  ;;  %v1328_v21 = vld [vmem:[%s3569_s10] sm:$0x3]  ;;  %v3397_v28 = vld [vmem:[%s3569_s10 + $0x2] sm:$0x3] }
 0x21d   : > { %v1357_v37 = vrot.slane %v1345_v34, 4  ;;  %v1288_v38 = vpop.f32.mrf.mxu1  ;;  %v1467_v51 = vrot.slane %v1465_v46, 3  ;;  %v1470_v54 = vrot.slane %v1468_v22, 4  ;;  %v1564_v15 = vrot.slane %v3333_v11, 5 }
 0x21e   : > { %vm1336_vm7 = vcmp.ge.f32.partialorder %v1323_v35, 0.0  ;;  %v1341_v40 = vmul.f32 0.1, %v1323_v35  ;;  %v1938_v41 = vrot.slane %v1323_v35, 4 }
 0x21f   : > { %v1358_v42 = vsel %vm1302_vm4, %v1355_v32, %v1357_v37  ;;  %v2741_v43 = vpop.f32.mrf.mxu1  ;;  %v1471_v5 = vor.u32 %v1470_v54, %v1467_v51 }
 0x220   : > { %v1370_v47 = vsel %vm3142_vm0, %v1358_v42, 0.0  ;;  %v1346_v49 = vsel %vm1336_vm7, %v1323_v35, %v1341_v40  ;;  %v3350_v50 = vsel %vm1302_vm4, %v1936_v29, %v1938_v41 }
 0x221   : > { %v1374_v52 = vpack.c.bf16 %v1370_v47, %v1369_v23  ;;  %v1359_v53 = vrot.slane %v1346_v49, 4  ;;  %v2571_v47 = vld [vmem:[%s3611_s29] ss:$0 sm:$0xff] }
 0x223   : > { %v1360_v18 = vsel %vm1302_vm4, %v1357_v37, %v1359_v53  ;;  %v1372_v56 = vsel %vm3181_vm13, %v1359_v53, 0.0  ;;  %v1380_v58 = vrot.slane %v1374_v52, 2  ;;  %v1473_v59 = vshrl.u32 %v1374_v52, 16 }
 0x224   : > { %v1371_v61 = vsel %vm3172_vm5, %v1360_v18, 0.0  ;;  %v1476_v19 = vshll.u32 %v1374_v52, 16  ;;  %v1565_v14 = vrot.slane %v1374_v52, 5 }
 0x225   : > { %v1375_v62 = vpack.c.bf16 %v1372_v56, %v1371_v61  ;;  %v1381_v63 = vsel %vm893_vm3, %v1379_v57, %v1380_v58  ;;  %v1475_v0 = vrot.slane %v1473_v59, 3 }
 0x226   : > { %2745 = vmatmul.mubr.msk.bf16.vlgmr.msra.gmra.mxu0 %vm708_vm9, %v1381_v63  ;;  %v1478_v1 = vrot.slane %v1476_v19, 4  ;;  %v1566_v17 = vsel %vm998_vm10, %v1564_v15, %v1565_v14 }
 0x227   : > { %2771 = vmatpush3.bf16.msra.mxu0 %v1579_v55  ;;  %2748 = vmatprep.mubr.msk.bf16.mxu0 %vm3600_vm15, %v2943_v2  ;;  %v1482_v3 = vshrl.u32 %v1375_v62, 16  ;;  %v1485_v4 = vshll.u32 %v1375_v62, 16  ;;  %v1382_v6 = vrot.slane %v1375_v62, 2  ;;  %v1567_v32 = vrot.slane %v1375_v62, 5 }
 0x228   : > { %v1479_v25 = vor.u32 %v1478_v1, %v1475_v0 }
 0x229   : > { %v1484_v9 = vrot.slane %v1482_v3, 3  ;;  %v1487_v10 = vrot.slane %v1485_v4, 4  ;;  %v1383_v12 = vsel %vm893_vm3, %v1380_v58, %v1382_v6  ;;  %v1568_v20 = vsel %vm998_vm10, %v1565_v14, %v1567_v32  ;;  %vm3608_vm3 = vmmov %vm3607_vm8 }
 0x22a   : > { %v1480_v8 = vsel %vm1463_vm12, %v1471_v5, %v1479_v25  ;;  %2838 = vmatprep.subr.msk.bf16.mxu1 %vm3608_vm3, %v1328_v21  ;;  %vm3609_vm14 = vmmov %vm3608_vm3 }
 0x22b   : > { %2759 = vmatmul.mubr.msk.bf16.vlgmr.msra.gmra.mxu1 %vm708_vm9, %v1480_v8  ;;  %v1488_v13 = vor.u32 %v1487_v10, %v1484_v9  ;;  %v1720_v27 = vsel %vm3609_vm14, %v1328_v21, 0  ;;  %vm3610_vm10 = vmmov %vm3608_vm3  ;;  %vm3612_vm3 = vcmask 1046528  }
 0x22c   : > { %2762 = vmatprep.mubr.msk.bf16.mxu1 %vm3600_vm15, %v2943_v2  ;;  %2785 = vmatpush3.bf16.msra.mxu1 %v1720_v27 }
 0x22d   : > { %v1489_v7 = vsel %vm1463_vm12, %v1479_v25, %v1488_v13  ;;  %2839 = vmatprep.subr.msk.bf16.mxu1 %vm3610_vm10, %v3397_v28  ;;  %vm3613_vm10 = vmmov %vm3612_vm3 }
 0x22e   : > { %2749 = vmatmul.mubr.msk.bf16.gmra.mxu0 %vm708_vm9, %v1383_v12 }
 0x22f   : > { %2752 = vmatprep.mubr.msk.bf16.mxu0 %vm3600_vm15, %v2943_v2 }
 0x233   : > { %2763 = vmatmul.mubr.msk.bf16.gmra.mxu1 %vm708_vm9, %v1489_v7 }
 0x234   : > { %2766 = vmatprep.mubr.msk.bf16.mxu1 %vm3600_vm15, %v2943_v2 }
 0x236   : > { %2753 = vmatmul.mubr.msk.bf16.gmra.mxu0 %vm708_vm9, %v1382_v6 }
 0x237   : > { %2772 = vmatprep.mubr.msk.bf16.mxu0 %vm3600_vm15, %v2943_v2 }
 0x23b   : > { %2767 = vmatmul.mubr.msk.bf16.gmra.mxu1 %vm708_vm9, %v1488_v13 }
 0x23e   : > { %2773 = vmatmul.mubr.msk.bf16.vlgmr.msra.gmra.mxu0 %vm708_vm9, %v1566_v17 }
 0x23f   : > { %2776 = vmatprep.mubr.msk.bf16.mxu0 %vm3600_vm15, %v2943_v2 }
 0x246   : > { %2777 = vmatmul.mubr.msk.bf16.gmra.mxu0 %vm708_vm9, %v1568_v20 }
 0x247   : > { %2780 = vmatprep.mubr.msk.bf16.mxu0 %vm3600_vm15, %v2943_v2 }
 0x24e   : > { %2781 = vmatmul.mubr.msk.bf16.gmra.mxu0 %vm708_vm9, %v1567_v32 }
 0x2e6   : > { %v1430_v29 = vpop.f32.mrf.mxu0 }
 0x2e7   : > { %v1458_v57 = vadd.f32 %v2571_v47, %v1430_v29 }
 0x2e8   : > { %v2746_v11 = vpop.f32.mrf.mxu0 }
 0x2ea   : > { %v1433_v31 = vpop.f32.mrf.mxu0 }
 0x2eb   : > { %v1536_v34 = vpop.f32.mrf.mxu1  ;;  %v1459_v61 = vadd.f32 %v2571_v47, %v1433_v31 }
 0x2ec   : > { %v2747_v35 = vpop.f32.mrf.mxu0  ;;  %v1558_v56 = vadd.f32 %v1536_v34, %v1458_v57 }
 0x2ed   : > { %v2760_v36 = vpop.f32.mrf.mxu1 }
 0x2ee   : > { %v1438_v37 = vpop.f32.mrf.mxu0 }
 0x2ef   : > { %v1539_v38 = vpop.f32.mrf.mxu1  ;;  %v1460_v3 = vadd.f32 %v2571_v47, %v1438_v37 }
 0x2f0   : > { %v2750_v40 = vpop.f32.mrf.mxu0  ;;  %v1559_v62 = vadd.f32 %v1539_v38, %v1459_v61 }
 0x2f1   : > { %v2761_v41 = vpop.f32.mrf.mxu1 }
 0x2f2   : > { %v1441_v42 = vpop.f32.mrf.mxu0 }
 0x2f3   : > { %v1544_v43 = vpop.f32.mrf.mxu1  ;;  %v1461_v10 = vadd.f32 %v2571_v47, %v1441_v42 }
 0x2f4   : > { %v2751_v45 = vpop.f32.mrf.mxu0  ;;  %v1560_v25 = vadd.f32 %v1544_v43, %v1460_v3 }
 0x2f5   : > { %v2764_v46 = vpop.f32.mrf.mxu1 }
 0x2f6   : > { %v1446_v22 = vpop.f32.mrf.mxu0 }
 0x2f7   : > { %v1547_v23 = vpop.f32.mrf.mxu1  ;;  %v1462_v27 = vadd.f32 %v2571_v47, %v1446_v22 }
 0x2f8   : > { %v2754_v49 = vpop.f32.mrf.mxu0  ;;  %v1561_v17 = vadd.f32 %v1547_v23, %v1461_v10 }
 0x2f9   : > { %v2765_v52 = vpop.f32.mrf.mxu1 }
 0x2fa   : > { %v1449_v53 = vpop.f32.mrf.mxu0 }
 0x2fb   : > { %v1552_v55 = vpop.f32.mrf.mxu1 }
 0x2fc   : > { %v2755_v18 = vpop.f32.mrf.mxu0  ;;  %v1562_v37 = vadd.f32 %v1552_v55, %v1462_v27 }
 0x2fd   : > { %v2768_v58 = vpop.f32.mrf.mxu1 }
 0x2fe   : > { %v1615_v59 = vpop.f32.mrf.mxu0 }
 0x2ff   : > { %v1555_v51 = vpop.f32.mrf.mxu1  ;;  %v1637_v54 = vadd.f32 %v1615_v59, %v1558_v56 }
 0x300   : > { %v2774_v19 = vpop.f32.mrf.mxu0 }
 0x301   : > { %v1647_v63 = vmul.f32 0.1, %v1637_v54  ;;  %v2769_v0 = vpop.f32.mrf.mxu1  ;;  %vm1642_vm2 = vcmp.ge.f32.partialorder %v1637_v54, 0.0 }
 0x302   : > { %v1618_v1 = vpop.f32.mrf.mxu0 }
 0x303   : > { %v1638_v4 = vadd.f32 %v1618_v1, %v1559_v62  ;;  %v1652_v6 = vsel %vm1642_vm2, %v1637_v54, %v1647_v63 }
 0x304   : > { %v2775_v5 = vpop.f32.mrf.mxu0  ;;  %v1663_v7 = vrot.slane %v1652_v6, 1 }
 0x305   : > { %vm1643_vm7 = vcmp.ge.f32.partialorder %v1638_v4, 0.0  ;;  %v1648_v8 = vmul.f32 0.1, %v1638_v4 }
 0x306   : > { %v1623_v9 = vpop.f32.mrf.mxu0  ;;  %v1678_v34 = vsel %vm3114_vm11, %v1663_v7, 0.0  ;;  %vm3615_vm11 = vmmov %vm3612_vm3 }
 0x307   : > { %v1653_v12 = vsel %vm1643_vm7, %v1638_v4, %v1648_v8  ;;  %v1639_v13 = vadd.f32 %v1623_v9, %v1560_v25  ;;  %vm3614_vm7 = vmmov %vm3612_vm3 }
 0x308   : > { %v1664_v14 = vrot.slane %v1653_v12, 1  ;;  %v2778_v15 = vpop.f32.mrf.mxu0 }
 0x309   : > { %vm1644_vm8 = vcmp.ge.f32.partialorder %v1639_v13, 0.0  ;;  %v1649_v32 = vmul.f32 0.1, %v1639_v13  ;;  %v1330_v15 = vld [vmem:[%s3569_s10 + $0x4] sm:$0x3] }
 0x30a   : > { %v1665_v20 = vsel %vm3612_vm3, %v1663_v7, %v1664_v14  ;;  %v1626_v21 = vpop.f32.mrf.mxu0  ;;  %vm1852_vm3 = vsmask.f32 3328 }
 0x30b   : > { %v1679_v29 = vsel %vm3125_vm1, %v1665_v20, 0.0  ;;  %v1654_v11 = vsel %vm1644_vm8, %v1639_v13, %v1649_v32  ;;  %v1640_v31 = vadd.f32 %v1626_v21, %v1561_v17 }
 0x30c   : > { %v1666_v35 = vrot.slane %v1654_v11, 1  ;;  %v2779_v36 = vpop.f32.mrf.mxu0  ;;  %v1684_v38 = vpack.c.bf16 %v1679_v29, %v1678_v34 }
 0x30d   : > { %vm1645_vm14 = vcmp.ge.f32.partialorder %v1640_v31, 0.0  ;;  %v1650_v40 = vmul.f32 0.1, %v1640_v31 }
 0x30e   : > { %v1631_v41 = vpop.f32.mrf.mxu0  ;;  %v1667_v45 = vsel %vm3613_vm10, %v1664_v14, %v1666_v35  ;;  %v1688_v47 = vshrl.u32 %v1684_v38, 16  ;;  %v1691_v49 = vshll.u32 %v1684_v38, 16  ;;  %v1785_v7 = vrot.slane %v1684_v38, 4 }
 0x30f   : > { %v1655_v42 = vsel %vm1645_vm14, %v1640_v31, %v1650_v40  ;;  %v1641_v43 = vadd.f32 %v1631_v41, %v1562_v37  ;;  %v1680_v53 = vsel %vm3133_vm6, %v1667_v45, 0.0  ;;  %v1948_v41 = vld [vmem:[%s3571_s12] sm:$0x3] }
 0x310   : > { %v1668_v46 = vrot.slane %v1655_v42, 1  ;;  %v2782_v22 = vpop.f32.mrf.mxu0  ;;  %v1690_v59 = vrot.slane %v1688_v47, 3  ;;  %v1693_v61 = vrot.slane %v1691_v49, 4  ;;  %v1853_v21 = vrot.slane %v1688_v47, 4 }
 0x311   : > { %vm1646_vm2 = vcmp.ge.f32.partialorder %v1641_v43, 0.0  ;;  %v1651_v23 = vmul.f32 0.1, %v1641_v43 }
 0x312   : > { %v1669_v24 = vsel %vm3614_vm7, %v1666_v35, %v1668_v46  ;;  %v1634_v52 = vpop.f32.mrf.mxu0  ;;  %v1694_v25 = vor.u32 %v1693_v61, %v1690_v59 }
 0x313   : > { %v1681_v57 = vsel %vm3142_vm0, %v1669_v24, 0.0  ;;  %v1656_v55 = vsel %vm1646_vm2, %v1641_v43, %v1651_v23  ;;  %v1949_v43 = vld [vmem:[%s3571_s12 + $0x2] sm:$0x3]  ;;  %v2580_v52 = vld [vmem:[%s3570_s11] ss:$0 sm:$0xff] }
 0x314   : > { %v1685_v18 = vpack.c.bf16 %v1681_v57, %v1680_v53  ;;  %v1670_v56 = vrot.slane %v1656_v55, 1  ;;  %v2783_v58 = vpop.f32.mrf.mxu0 }
 0x316   : > { %v1671_v51 = vsel %vm3615_vm11, %v1668_v46, %v1670_v56  ;;  %v1683_v54 = vsel %vm3181_vm13, %v1670_v56, 0.0  ;;  %v1696_v19 = vshrl.u32 %v1685_v18, 16  ;;  %v1699_v62 = vshll.u32 %v1685_v18, 16  ;;  %v1950_v46 = vld [vmem:[%s3571_s12 + $0x4] sm:$0x3] }
 0x317   : > { %v1682_v63 = vsel %vm3172_vm5, %v1671_v51, 0.0  ;;  %v1786_v48 = vrot.slane %v1685_v18, 4  ;;  %vm3616_vm13 = vcmask 1041408  }
 0x318   : > { %v1686_v0 = vpack.c.bf16 %v1683_v54, %v1682_v63  ;;  %v1698_v1 = vrot.slane %v1696_v19, 3  ;;  %v1701_v3 = vrot.slane %v1699_v62, 4  ;;  %v1797_v13 = vsel %vm3616_vm13, %v3397_v28, 0  ;;  %vm3617_vm8 = vmmov %vm3616_vm13 }
 0x319   : > { %v1787_v17 = vsel %vm1302_vm4, %v1785_v7, %v1786_v48  ;;  %v1856_v32 = vrot.slane %v1696_v19, 4  ;;  %v1857_v20 = vrot.slane %v1699_v62, 5  ;;  %v1854_v28 = vrot.slane %v1691_v49, 5  ;;  %vm3618_vm14 = vmmov %vm3617_vm8 }
 0x31a   : > { %v1705_v4 = vshrl.u32 %v1686_v0, 16  ;;  %v1708_v5 = vshll.u32 %v1686_v0, 16  ;;  %v1702_v6 = vor.u32 %v1701_v3, %v1698_v1  ;;  %v1788_v27 = vrot.slane %v1686_v0, 4  ;;  %vm3619_vm10 = vmmov %vm3617_vm8 }
 0x31b   : > { %v1858_v29 = vor.u32 %v1857_v20, %v1856_v32  ;;  %v1871_v11 = vsel %vm3618_vm14, %v1330_v15, 0  ;;  %v1855_v31 = vor.u32 %v1854_v28, %v1853_v21  ;;  %2841 = vmatprep.subr.msk.bf16.mxu0 %vm3619_vm10, %v1948_v41  ;;  %vm3620_vm2 = vmmov %vm3617_vm8 }
 0x31c   : > { %v1707_v8 = vrot.slane %v1705_v4, 3  ;;  %v1710_v9 = vrot.slane %v1708_v5, 4  ;;  %v1703_v10 = vsel %vm1463_vm12, %v1694_v25, %v1702_v6  ;;  %v1789_v34 = vsel %vm1302_vm4, %v1786_v48, %v1788_v27  ;;  %vm3621_vm7 = vmmov %vm3620_vm2 }
 0x31d   : > { %2786 = vmatprep.mubr.msk.bf16.mxu1 %vm708_vm9, %v1703_v10  ;;  %v1860_v35 = vrot.slane %v1705_v4, 4  ;;  %v1861_v36 = vrot.slane %v1708_v5, 5  ;;  %v1859_v37 = vsel %vm1852_vm3, %v1855_v31, %v1858_v29  ;;  %v1986_v42 = vsel %vm3620_vm2, %v1948_v41, 0  ;;  %vm3622_vm11 = vmmov %vm3620_vm2 }
 0x31e   : > { %v1711_v12 = vor.u32 %v1710_v9, %v1707_v8  ;;  %2803 = vmatpush3.bf16.msra.mxu0 %v1986_v42  ;;  %v2069_v45 = vsel %vm3622_vm11, %v1949_v43, 0  ;;  %vm3623_vm13 = vmmov %vm3620_vm2  ;;  %vm3624_vm11 = vcmask 1046528  }
 0x31f   : > { %v1862_v38 = vor.u32 %v1861_v36, %v1860_v35  ;;  %2843 = vmatprep.subr.msk.bf16.mxu0 %vm3623_vm13, %v1950_v46  ;;  %vm3625_vm13 = vmmov %vm3621_vm7 }
 0x320   : > { %v1712_v14 = vsel %vm1463_vm12, %v1702_v6, %v1711_v12 }
 0x321   : > { %2787 = vmatmul.mubr.msk.bf16.vlgmr.msra.gmra.mxu1 %vm708_vm9, %v1712_v14  ;;  %v1863_v40 = vsel %vm1852_vm3, %v1858_v29, %v1862_v38  ;;  %v2133_v38 = vsel %vm3621_vm7, %v1950_v46, 0  ;;  %v1952_v46 = vld [vmem:[%s3573_s14] sm:$0x3] }
 0x322   : > { %2791 = vmatpush3.bf16.msra.mxu1 %v1797_v13  ;;  %2792 = vmatprep.mubr.msk.bf16.mxu1 %vm708_vm9, %v1787_v17 }
 0x323   : > { %2840 = vmatprep.subr.msk.bf16.mxu1 %vm3617_vm8, %v1330_v15 }
 0x329   : > { %2793 = vmatmul.mubr.msk.bf16.vlgmr.msra.gmra.mxu1 %vm708_vm9, %v1789_v34 }
 0x32a   : > { %2797 = vmatpush3.bf16.msra.mxu1 %v1871_v11  ;;  %2798 = vmatprep.mubr.msk.bf16.mxu1 %vm708_vm9, %v1859_v37 }
 0x32b   : > { %2842 = vmatprep.subr.msk.bf16.mxu1 %vm3621_vm7, %v1949_v43 }
 0x331   : > { %2799 = vmatmul.mubr.msk.bf16.vlgmr.msra.gmra.mxu1 %vm708_vm9, %v1863_v40 }
 0x332   : > { %2809 = vmatpush3.bf16.msra.mxu1 %v2069_v45 }
 0x333   : > { %2820 = vmatprep.subr.bf16.mxu1 %v2943_v2 }
 0x3e1   : > { %v2788_v22 = vpop.f32.mrf.mxu1 }
 0x3e2   : > { %v1779_v55 = vadd.f32 %v2788_v22, %v2580_v52 }
 0x3e3   : > { %v1756_v23 = vpop.f32.mrf.mxu1 }
 0x3e4   : > { %v1777_v56 = vadd.f32 %v2580_v52, %v1756_v23 }
 0x3e5   : > { %v2789_v47 = vpop.f32.mrf.mxu1 }
 0x3e6   : > { %v1780_v61 = vadd.f32 %v2789_v47, %v2580_v52 }
 0x3e7   : > { %v1759_v49 = vpop.f32.mrf.mxu1 }
 0x3e8   : > { %v1778_v1 = vadd.f32 %v2580_v52, %v1759_v49  ;;  %v1953_v49 = vld [vmem:[%s3573_s14 + $0x2] sm:$0x3] }
 0x3e9   : > { %v2794_v24 = vpop.f32.mrf.mxu1 }
 0x3ea   : > { %v1850_v58 = vadd.f32 %v2794_v24, %v1779_v55 }
 0x3eb   : > { %v1833_v53 = vpop.f32.mrf.mxu1 }
 0x3ec   : > { %v1848_v51 = vadd.f32 %v1833_v53, %v1777_v56 }
 0x3ed   : > { %v2795_v57 = vpop.f32.mrf.mxu1 }
 0x3ee   : > { %v1851_v62 = vadd.f32 %v2795_v57, %v1780_v61  ;;  %v2587_v57 = vld [vmem:[%s3572_s13] ss:$0 sm:$0xff] }
 0x3ef   : > { %v1836_v18 = vpop.f32.mrf.mxu1 }
 0x3f0   : > { %v1849_v6 = vadd.f32 %v1836_v18, %v1778_v1 }
 0x3f1   : > { %v2800_v59 = vpop.f32.mrf.mxu1 }
 0x3f2   : > { %v1924_v54 = vadd.f32 %v2800_v59, %v1850_v58 }
 0x3f3   : > { %v1907_v19 = vpop.f32.mrf.mxu1 }
 0x3f4   : > { %v3458_v63 = vadd.f32 %v3337_v39, %v1924_v54  ;;  %v1922_v0 = vadd.f32 %v1907_v19, %v1848_v51 }
 0x3f5   : > { %v2801_v3 = vpop.f32.mrf.mxu1 }
 0x3f6   : > { %vm1958_vm8 = vcmp.ge.f32.partialorder %v3458_v63, 0.0  ;;  %v1962_v4 = vmul.f32 0.1, %v3458_v63  ;;  %v1944_v5 = vadd.f32 %v3320_v60, %v1922_v0  ;;  %v1925_v25 = vadd.f32 %v2801_v3, %v1851_v62 }
 0x3f7   : > { %v1910_v8 = vpop.f32.mrf.mxu1 }
 0x3f8   : > { %v1947_v9 = vadd.f32 %v3350_v50, %v1925_v25  ;;  %v1966_v10 = vsel %vm1958_vm8, %v3458_v63, %v1962_v4  ;;  %v1960_v48 = vmul.f32 0.1, %v1944_v5  ;;  %v1923_v12 = vadd.f32 %v1910_v8, %v1849_v6  ;;  %vm3626_vm8 = vmmov %vm3621_vm7 }
 0x3f9   : > { %vm1956_vm14 = vcmp.ge.f32.partialorder %v1944_v5, 0.0  ;;  %v1970_v14 = vsel %vm3142_vm0, %v1966_v10, 0.0  ;;  %v2234_v24 = vsel %vm3626_vm8, %v1952_v46, 0 }
 0x3fa   : > { %vm1959_vm10 = vcmp.ge.f32.partialorder %v1947_v9, 0.0  ;;  %v1963_v39 = vmul.f32 0.1, %v1947_v9  ;;  %v3466_v13 = vadd.f32 %v3328_v16, %v1923_v12  ;;  %v1964_v60 = vsel %vm1956_vm14, %v1944_v5, %v1960_v48  ;;  %vm3627_vm14 = vmmov %vm3621_vm7 }
 0x3fb   : > { %v1968_v20 = vsel %vm3125_vm1, %v1964_v60, 0.0  ;;  %v2294_v52 = vsel %vm3627_vm14, %v1953_v49, 0 }
 0x3fc   : > { %v1967_v7 = vsel %vm1959_vm10, %v1947_v9, %v1963_v39  ;;  %vm1957_vm2 = vcmp.ge.f32.partialorder %v3466_v13, 0.0  ;;  %v1961_v50 = vmul.f32 0.1, %v3466_v13 }
 0x3fd   : > { %v1971_v15 = vsel %vm3172_vm5, %v1967_v7, 0.0 }
 0x3fe   : > { %v1973_v17 = vpack.c.bf16 %v1971_v15, %v1970_v14  ;;  %v1965_v32 = vsel %vm1957_vm2, %v3466_v13, %v1961_v50 }
 0x3ff   : > { %v1969_v16 = vsel %vm3133_vm6, %v1965_v32, 0.0 }
 0x400   : > { %v2054_v21 = vshrl.u32 %v1973_v17, 16  ;;  %v1972_v28 = vpack.c.bf16 %v1969_v16, %v1968_v20  ;;  %v2057_v27 = vshll.u32 %v1973_v17, 16  ;;  %v1977_v29 = vrot.slane %v1973_v17, 1 }
 0x401   : > { %v2124_v11 = vrot.slane %v1973_v17, 6 }
 0x402   : > { %v2056_v31 = vrot.slane %v2054_v21, 3  ;;  %v1976_v34 = vrot.slane %v1972_v28, 1  ;;  %v2123_v35 = vrot.slane %v1972_v28, 6  ;;  %v2046_v36 = vshrl.u32 %v1972_v28, 16 }
 0x403   : > { %v2049_v37 = vshll.u32 %v1972_v28, 16  ;;  %v2059_v40 = vrot.slane %v2057_v27, 4 }
 0x404   : > { %v1978_v41 = vsel %vm3624_vm11, %v1976_v34, %v1977_v29  ;;  %v2125_v42 = vsel %vm3625_vm13, %v2123_v35, %v2124_v11  ;;  %v2048_v43 = vrot.slane %v2046_v36, 3  ;;  %vm3628_vm13 = vmmov %vm3624_vm11 }
 0x405   : > { %v2051_v45 = vrot.slane %v2049_v37, 4  ;;  %2804 = vmatprep.mubr.msk.bf16.mxu0 %vm708_vm9, %v1978_v41  ;;  %v2060_v23 = vor.u32 %v2059_v40, %v2056_v31 }
 0x406   : > { %2805 = vmatmul.mubr.msk.bf16.vlgmr.msra.gmra.mxu0 %vm708_vm9, %v1977_v29 }
 0x407   : > { %v2052_v22 = vor.u32 %v2051_v45, %v2048_v43  ;;  %2815 = vmatpush3.bf16.msra.mxu0 %v2133_v38  ;;  %2816 = vmatprep.mubr.msk.bf16.mxu0 %vm708_vm9, %v2125_v42  ;;  %v1954_v43 = vld [vmem:[%s3573_s14 + $0x4] sm:$0x3] }
 0x408   : > { %2826 = vmatprep.subr.bf16.mxu0 %v2943_v2 }
 0x409   : > { %v2061_v47 = vsel %vm1463_vm12, %v2052_v22, %v2060_v23 }
 0x40a   : > { %2810 = vmatprep.mubr.msk.bf16.mxu1 %vm708_vm9, %v2061_v47 }
 0x40b   : > { %2811 = vmatmul.mubr.msk.bf16.vlgmr.msra.gmra.mxu1 %vm708_vm9, %v2060_v23 }
 0x40c   : > { %2822 = vmatprep.mubr.msk.bf16.mxu1 %vm3600_vm15, %v2943_v2  ;;  %2821 = vmatpush3.bf16.msra.mxu1 %v2234_v24 }
 0x40d   : > { %2832 = vmatprep.subr.bf16.mxu1 %v2943_v2 }
 0x40e   : > { %2817 = vmatmul.mubr.msk.bf16.vlgmr.msra.gmra.mxu0 %vm708_vm9, %v2124_v11 }
 0x40f   : > { %2828 = vmatprep.mubr.msk.bf16.mxu0 %vm3600_vm15, %v2943_v2  ;;  %2827 = vmatpush3.bf16.msra.mxu0 %v2294_v52 }
 0x4c6   : > { %v2806_v53 = vpop.f32.mrf.mxu0 }
 0x4c7   : > { %v2044_v58 = vadd.f32 %v2806_v53, %v2587_v57 }
 0x4c8   : > { %v2022_v55 = vpop.f32.mrf.mxu0 }
 0x4c9   : > { %v2042_v51 = vadd.f32 %v2587_v57, %v2022_v55 }
 0x4ca   : > { %v2807_v18 = vpop.f32.mrf.mxu0 }
 0x4cb   : > { %v2812_v56 = vpop.f32.mrf.mxu1 }
 0x4cc   : > { %v2025_v59 = vpop.f32.mrf.mxu0  ;;  %v2121_v54 = vadd.f32 %v2812_v56, %v2044_v58 }
 0x4cd   : > { %v2105_v61 = vpop.f32.mrf.mxu1  ;;  %v2043_v5 = vadd.f32 %v2587_v57, %v2025_v59  ;;  %v2593_v59 = vld [vmem:[%s3574_s15] ss:$0 sm:$0xff] }
 0x4ce   : > { %v2818_v62 = vpop.f32.mrf.mxu0  ;;  %v2119_v0 = vadd.f32 %v2105_v61, %v2042_v51 }
 0x4cf   : > { %v2813_v19 = vpop.f32.mrf.mxu1  ;;  %v2185_v1 = vadd.f32 %v2818_v62, %v2121_v54 }
 0x4d0   : > { %v2169_v4 = vpop.f32.mrf.mxu0 }
 0x4d1   : > { %v2108_v3 = vpop.f32.mrf.mxu1  ;;  %v2183_v25 = vadd.f32 %v2169_v4, %v2119_v0  ;;  %v2191_v6 = vmul.f32 0.1, %v2185_v1  ;;  %vm2188_vm10 = vcmp.ge.f32.partialorder %v2185_v1, 0.0 }
 0x4d2   : > { %v2819_v8 = vpop.f32.mrf.mxu0  ;;  %v2120_v9 = vadd.f32 %v2108_v3, %v2043_v5 }
 0x4d3   : > { %vm2186_vm2 = vcmp.ge.f32.partialorder %v2183_v25, 0.0  ;;  %v2189_v10 = vmul.f32 0.1, %v2183_v25  ;;  %v2194_v39 = vsel %vm2188_vm10, %v2185_v1, %v2191_v6 }
 0x4d4   : > { %v2172_v48 = vpop.f32.mrf.mxu0  ;;  %v2201_v60 = vrot.slane %v2194_v39, 1 }
 0x4d5   : > { %v2184_v12 = vadd.f32 %v2172_v48, %v2120_v9  ;;  %v2192_v7 = vsel %vm2186_vm2, %v2183_v25, %v2189_v10 }
 0x4d6   : > { %v2198_v15 = vrot.slane %v2192_v7, 1  ;;  %v2210_v16 = vsel %vm3172_vm5, %v2201_v60, 0.0 }
 0x4d7   : > { %vm2187_vm7 = vcmp.ge.f32.partialorder %v2184_v12, 0.0  ;;  %v2190_v14 = vmul.f32 0.1, %v2184_v12 }
 0x4d8   : > { %v2207_v21 = vsel %vm3125_vm1, %v2198_v15, 0.0  ;;  %vm3629_vm1 = vmmov %vm3626_vm8 }
 0x4d9   : > { %v2193_v50 = vsel %vm2187_vm7, %v2184_v12, %v2190_v14  ;;  %v2350_v23 = vsel %vm3629_vm1, %v1954_v43, 0 }
 0x4da   : > { %v2199_v17 = vrot.slane %v2193_v50, 1 }
 0x4dc   : > { %v2200_v32 = vsel %vm3624_vm11, %v2198_v15, %v2199_v17  ;;  %v2202_v20 = vsel %vm3628_vm13, %v2199_v17, %v2201_v60 }
 0x4dd   : > { %v2208_v28 = vsel %vm3133_vm6, %v2200_v32, 0.0  ;;  %v2209_v27 = vsel %vm3142_vm0, %v2202_v20, 0.0 }
 0x4de   : > { %v2211_v29 = vpack.c.bf16 %v2208_v28, %v2207_v21  ;;  %v2212_v11 = vpack.c.bf16 %v2210_v16, %v2209_v27 }
 0x4e0   : > { %v2287_v31 = vrot.slane %v2211_v29, 4  ;;  %v2288_v34 = vrot.slane %v2212_v11, 4  ;;  %v2214_v35 = vshrl.u32 %v2211_v29, 16  ;;  %v2217_v36 = vshll.u32 %v2211_v29, 16 }
 0x4e1   : > { %v2222_v37 = vshrl.u32 %v2212_v11, 16  ;;  %v2225_v38 = vshll.u32 %v2212_v11, 16 }
 0x4e2   : > { %v2289_v44 = vsel %vm1302_vm4, %v2287_v31, %v2288_v34  ;;  %v2216_v40 = vrot.slane %v2214_v35, 3  ;;  %v2219_v41 = vrot.slane %v2217_v36, 4  ;;  %v2339_v47 = vrot.slane %v2214_v35, 4 }
 0x4e3   : > { %2829 = vmatmul.mubr.msk.bf16.vlgmr.msra.gmra.mxu0 %vm708_vm9, %v2289_v44  ;;  %v2224_v26 = vrot.slane %v2222_v37, 3  ;;  %v2227_v42 = vrot.slane %v2225_v38, 4  ;;  %v2340_v49 = vrot.slane %v2217_v36, 5  ;;  %v2342_v24 = vrot.slane %v2222_v37, 4 }
 0x4e4   : > { %v2220_v45 = vor.u32 %v2219_v41, %v2216_v40  ;;  %v2343_v52 = vrot.slane %v2225_v38, 5 }
 0x4e5   : > { %v2228_v22 = vor.u32 %v2227_v42, %v2224_v26  ;;  %v2341_v53 = vor.u32 %v2340_v49, %v2339_v47 }
 0x4e6   : > { %v2344_v57 = vor.u32 %v2343_v52, %v2342_v24 }
 0x4e7   : > { %v2229_v46 = vsel %vm1463_vm12, %v2220_v45, %v2228_v22 }
 0x4e8   : > { %2823 = vmatmul.mubr.msk.bf16.vlgmr.msra.gmra.mxu1 %vm708_vm9, %v2229_v46  ;;  %v2345_v55 = vsel %vm1852_vm3, %v2341_v53, %v2344_v57 }
 0x4e9   : > { %2833 = vmatpush3.bf16.msra.mxu1 %v2350_v23  ;;  %2834 = vmatprep.mubr.msk.bf16.mxu1 %vm3600_vm15, %v2943_v2 }
 0x4f0   : > { %2835 = vmatmul.mubr.msk.bf16.vlgmr.msra.gmra.mxu1 %vm708_vm9, %v2345_v55 }
 0x5a3   : > { %v2330_v18 = vpop.f32.mrf.mxu0 }
 0x5a5   : > { %v2830_v56 = vpop.f32.mrf.mxu0 }
 0x5a7   : > { %v2333_v58 = vpop.f32.mrf.mxu0 }
 0x5a8   : > { %v2270_v61 = vpop.f32.mrf.mxu1 }
 0x5a9   : > { %v2831_v51 = vpop.f32.mrf.mxu0  ;;  %v2283_v19 = vadd.f32 %v2593_v59, %v2270_v61 }
 0x5aa   : > { %v2824_v54 = vpop.f32.mrf.mxu1 }
 0x5ab   : > { %v2337_v1 = vadd.f32 %v2330_v18, %v2283_v19 }
 0x5ac   : > { %v2273_v62 = vpop.f32.mrf.mxu1 }
 0x5ad   : > { %v2284_v0 = vadd.f32 %v2593_v59, %v2273_v62 }
 0x5ae   : > { %v2825_v2 = vpop.f32.mrf.mxu1 }
 0x5af   : > { %v2338_v6 = vadd.f32 %v2333_v58, %v2284_v0 }
 0x5b0   : > { %v2386_v3 = vpop.f32.mrf.mxu1 }
 0x5b1   : > { %v2393_v4 = vadd.f32 %v2386_v3, %v2337_v1 }
 0x5b2   : > { %v2836_v5 = vpop.f32.mrf.mxu1 }
 0x5b3   : > { %v2395_v25 = vadd.f32 %v2393_v4, %v3466_v13 }
 0x5b4   : > { %v2389_v8 = vpop.f32.mrf.mxu1 }
 0x5b5   : > { %v2397_v9 = vsel %vm3133_vm6, %v2395_v25, 0.0  ;;  %v2394_v10 = vadd.f32 %v2389_v8, %v2338_v6 }
 0x5b6   : > { %2399 = vst.msk [vmem:[%s607_s17] sm:$0xff] %vm708_vm9, %v2397_v9  ;;  %v2837_v48 = vpop.f32.mrf.mxu1 }
 0x5b7   : > { %v2396_v12 = vadd.f32 %v2394_v10, %v3458_v63 }
 0x5b9   : > { %v2398_v39 = vsel %vm3142_vm0, %v2396_v12, 0.0 }
 0x5ba   : > { %2400 = vst.msk [vmem:[%s607_s17 + $0x8] sm:$0xff] %vm708_vm9, %v2398_v39 }
 0x5bb PF: > { %s32_s30 = sadd.s32 1, %s2940_s30   ;;  %s3630_s27 = sld [smem:[#allocation5_spill]] }
 0x5bc   : > { %p29_p13 = scmp.ge.s32.totalorder %s32_s30, 8   ;;  %s3631_s25 = sld [smem:[#allocation6_spill]] }
 0x5bd   : > { %s3632_s29 = sld [smem:[#allocation7_spill]]  ;;  %s3633_s26 = smov %s2932_s28 }
 0x5be   :  { %31 = sbr.rel (!%p29_p13) target bundleno = 26 (0x1a), region = 116 }
 0x5c2   : > { %s3634_s28 = smov %s3631_s25 }

</bundles_post_ra>
